<compile_context>
chip_gen: v5e
topology: v5e:2x2
jax: 0.10.0
libtpu: 0.0.40
codegen_flags: <defaults>
</compile_context>

<pallas_src>
import functools
import math

import jax
import jax.numpy as jnp
from jax import lax
from jax.experimental import pallas as pl
from jax.experimental.pallas import tpu as pltpu

GEOM_DIM = 6                      # g.ndata['Geometric'] dim
EF_DIM = 18                       # distance(1)+angle(1)+bin_angles(8)+discrete_bin_edges(8)
EDGE_EXTRA = GEOM_DIM + EF_DIM    # GcnSAGELayer always appends 24 aggregated dims
LN_EPS = 1e-5                     # torch.nn.LayerNorm default eps


# ---------------------------------------------------------------------------
# Single fused forward kernel
# ---------------------------------------------------------------------------
def _fused_forward_kernel(*refs, n_enc, n_dec, d0, nc, out_w):
    it = iter(refs)
    agg_ref = next(it)       # (tn, 24)  graph-constant (A^T@Geom | ef_sum) * norm
    x_ref = next(it)         # (tn, d0)  node input features
    mask_ref = next(it)      # (tn, 1)   1.0 where node is masked
    token_ref = next(it)     # (1, d0)   enc_mask_token

    enc = [(next(it), next(it), next(it)) for _ in range(n_enc)]   # (W_h, W_agg, bgb)
    np_w_ref = next(it)      # (hidden, nc)
    np_bgb_ref = next(it)    # (3, nc)      rows: bias / gamma / beta
    e2d_w_ref = next(it)     # (hidden, hidden)  bias-free
    dec = [(next(it), next(it), next(it)) for _ in range(n_dec)]

    out_ref = next(it)       # (tn, out_w)  lane-dense packed output slab

    def mm(a, b):
        return jnp.dot(a, b, preferred_element_type=jnp.float32)

    def layernorm(z, g, beta):
        # single-pass: var = E[z^2] - E[z]^2 ; one rsqrt (EUP slot)
        inv_d = 1.0 / z.shape[-1]
        mu = jnp.sum(z, axis=-1, keepdims=True) * inv_d
        ez2 = jnp.sum(z * z, axis=-1, keepdims=True) * inv_d
        var = ez2 - mu * mu
        return (z - mu) * lax.rsqrt(var + LN_EPS) * g + beta

    agg = agg_ref[...]

    # --- encoding_mask_noise: masked rows become exactly enc_mask_token ---
    h = jnp.where(mask_ref[...] > 0.5, token_ref[...], x_ref[...])

    def sage(h, wh_ref, wa_ref, bgb_ref):
        # Linear over concat(h, agg) expressed as two MXU passes (weight pre-split
        # in the wrapper -> no in-kernel lane concat of activations).
        bgb = bgb_ref[...]
        z = mm(h, wh_ref[...]) + mm(agg, wa_ref[...]) + bgb[0:1, :]
        return jnp.maximum(layernorm(z, bgb[1:2, :], bgb[2:3, :]), 0.0)

    # encoder (dropout prob = 0.0 -> identity)
    for lw in enc:
        h = sage(h, *lw)
    enc_rep = h

    # node_pred head: Linear + LayerNorm (no activation)
    np_bgb = np_bgb_ref[...]
    n_scores = layernorm(mm(enc_rep, np_w_ref[...]) + np_bgb[0:1, :],
                         np_bgb[1:2, :], np_bgb[2:3, :])

    # encoder_to_decoder: bias-free Linear
    h = mm(enc_rep, e2d_w_ref[...])

    # decoder
    for lw in dec:
        h = sage(h, *lw)

    # lane-dense packed output: cols [0:d0] recon, [d0:d0+nc] n_scores, rest zero
    tail = jnp.zeros((h.shape[0], out_w - d0 - nc), jnp.float32)
    out_ref[...] = jnp.concatenate([h, n_scores, tail], axis=-1)


# ---------------------------------------------------------------------------
# Graph preprocessing (done ONCE per graph, like g.ndata['norm'])
# ---------------------------------------------------------------------------
def preprocess_graph(adjT, geom, ef_sum, norm):
    """agg[dst, 24] = concat(sum_src Geom_src, sum_src edge_feats) * norm."""
    return (jnp.concatenate([adjT @ geom, ef_sum], axis=1) * norm).astype(jnp.float32)


# ---------------------------------------------------------------------------
# Wrapper
# ---------------------------------------------------------------------------
def _pack_sage(p):
    """Split W[(d_in+24), out] into (W_h, W_agg) and stack b/gamma/beta into one
    (3, out) array so each layer needs only 3 parameter DMAs."""
    w = p["w"]
    d_in = w.shape[0] - EDGE_EXTRA
    bgb = jnp.concatenate([p["b"], p["gamma"], p["beta"]], axis=0)
    return w[:d_in], w[d_in:], bgb


def forward(params, agg, x, mask_nodes, *, tile_rows=512):
    N, d0 = x.shape
    nc = params["np_w"].shape[1]
    out_w = max(128, ((d0 + nc + 127) // 128) * 128)   # lane-dense output width

    tile_n = min(tile_rows, N)
    tile_n = max(8, ((tile_n + 7) // 8) * 8)           # sublane alignment
    num_tiles = -(-N // tile_n)                        # cdiv — no dropped tail
    n_pad = tile_n * num_tiles

    def pad_rows(a):
        if a.shape[0] == n_pad:
            return a
        return jnp.pad(a, ((0, n_pad - a.shape[0]),) + ((0, 0),) * (a.ndim - 1))

    mask = jnp.zeros((N, 1), jnp.float32).at[mask_nodes, 0].set(1.0)
    agg_p, x_p, mask_p = map(pad_rows, (agg, x, mask))

    flat_params = []
    for p in params["encoder"]:
        flat_params += list(_pack_sage(p))
    flat_params += [params["np_w"],
                    jnp.concatenate([params["np_b"], params["np_gamma"],
                                     params["np_beta"]], axis=0),
                    params["e2d_w"]]
    for p in params["decoder"]:
        flat_params += list(_pack_sage(p))

    inputs = [agg_p, x_p, mask_p, params["enc_mask_token"]] + flat_params

    tiled = lambda i: (i, 0)
    full = lambda i: (0, 0)
    in_specs = [
        pl.BlockSpec((tile_n, EDGE_EXTRA), tiled),    # agg
        pl.BlockSpec((tile_n, d0), tiled),            # x
        pl.BlockSpec((tile_n, 1), tiled),             # mask
        pl.BlockSpec((1, d0), full),                  # enc_mask_token
    ] + [pl.BlockSpec(p.shape, full) for p in flat_params]

    out_shape = jax.ShapeDtypeStruct((n_pad, out_w), jnp.float32)
    out_specs = pl.BlockSpec((tile_n, out_w), tiled)

    kern = functools.partial(_fused_forward_kernel,
                             n_enc=len(params["encoder"]),
                             n_dec=len(params["decoder"]),
                             d0=d0, nc=nc, out_w=out_w)

    packed = pl.pallas_call(
        kern,
        out_shape=out_shape,
        grid_spec=pltpu.PrefetchScalarGridSpec(
            num_scalar_prefetch=0,
            grid=(num_tiles,),
            in_specs=in_specs,
            out_specs=out_specs,
        ),
        compiler_params=pltpu.CompilerParams(
            dimension_semantics=("parallel",),
            vmem_limit_bytes=32 * 1024 * 1024),
    )(*inputs)

    recon = packed[:N, :d0]
    n_scores = packed[:N, d0:d0 + nc]
    x_pred = recon[mask_nodes]
    x_true = x[mask_nodes]
    return x_pred, x_true, n_scores


# ---------------------------------------------------------------------------
# Parameter init (deterministic, mirrors the PyTorch module's shapes/init style)
# ---------------------------------------------------------------------------
def init_sage_layer(key, in_feats, out_feats):
    in_total = in_feats + EDGE_EXTRA
    stdv = 1.0 / math.sqrt(in_total)
    kw, kb = jax.random.split(key)
    return dict(
        w=jax.random.uniform(kw, (in_total, out_feats), jnp.float32, -stdv, stdv),
        b=jax.random.uniform(kb, (1, out_feats), jnp.float32, -stdv, stdv),
        gamma=jnp.ones((1, out_feats), jnp.float32),
        beta=jnp.zeros((1, out_feats), jnp.float32),
    )


def init_model(key, dims, node_classes):
    n_layers = len(dims) - 1
    keys = jax.random.split(key, 2 * n_layers + 3)
    encoder = [init_sage_layer(keys[i], dims[i], dims[i + 1]) for i in range(n_layers)]
    decoder = []
    for i in range(n_layers):
        decoder.insert(0, init_sage_layer(keys[n_layers + i], dims[i + 1], dims[i]))
    hidden = dims[-1]
    s = 1.0 / math.sqrt(hidden)
    e2d_w = jax.random.uniform(keys[-3], (hidden, hidden), jnp.float32, -s, s)
    np_w = jax.random.uniform(keys[-2], (hidden, node_classes), jnp.float32, -s, s)
    np_b = jax.random.uniform(keys[-1], (1, node_classes), jnp.float32, -s, s)
    return dict(
        encoder=encoder,
        decoder=decoder,
        e2d_w=e2d_w,
        np_w=np_w,
        np_b=np_b,
        np_gamma=jnp.ones((1, node_classes), jnp.float32),
        np_beta=jnp.zeros((1, node_classes), jnp.float32),
        enc_mask_token=jnp.zeros((1, dims[0]), jnp.float32),
    )


# ---------------------------------------------------------------------------
# Pure-JAX reference (same math) for a sanity check.
# ---------------------------------------------------------------------------
def reference(params, graph, x, mask_nodes):
    adjT, geom, ef_sum, norm = graph
    ahn = jnp.concatenate([adjT @ geom, ef_sum], axis=1) * norm

    def layer(p, h):
        z = jnp.concatenate([h, ahn], axis=1) @ p["w"] + p["b"]
        mu = z.mean(-1, keepdims=True)
        var = ((z - mu) ** 2).mean(-1, keepdims=True)
        z = (z - mu) / jnp.sqrt(var + LN_EPS) * p["gamma"] + p["beta"]
        return jnp.maximum(z, 0.0)

    N = x.shape[0]
    mask_bool = jnp.zeros((N,), jnp.bool_).at[mask_nodes].set(True)
    use_x = jnp.where(mask_bool[:, None], params["enc_mask_token"], x)
    h = use_x
    for p in params["encoder"]:
        h = layer(p, h)
    enc_rep = h
    z = enc_rep @ params["np_w"] + params["np_b"]
    mu = z.mean(-1, keepdims=True)
    var = ((z - mu) ** 2).mean(-1, keepdims=True)
    n_scores = (z - mu) / jnp.sqrt(var + LN_EPS) * params["np_gamma"] + params["np_beta"]
    h = enc_rep @ params["e2d_w"]
    for p in params["decoder"]:
        h = layer(p, h)
    return h[mask_nodes], x[mask_nodes], n_scores


if __name__ == "__main__":
    N = 64                      # nodes
    dims = [6, 32, 16]          # dimensions_layers
    node_classes = 5
    mask_rate = 0.25
    # TODO(synk): nn.Dropout is instantiated with p=0.0 here, so it is exactly identity.
    # TODO(synk): Tresh_distance only selects which 'distance' edge feature is fed;
    #             a single distance array is used here.
    # TODO(synk): the random node masking (torch.randperm) is done host-side and the
    #             resulting mask indices are passed to forward().

    root = jax.random.PRNGKey(0)
    (k_param, k_adj, k_dist, k_ang, k_feat, k_disc,
     k_geom, k_perm) = jax.random.split(root, 8)

    params = init_model(k_param, dims, node_classes)

    # --- dense synthetic graph ---
    A = (jax.random.uniform(k_adj, (N, N)) < 0.3).astype(jnp.float32)     # A[src, dst]
    adjT = A.T                                                            # [dst, src]
    deg_in = A.sum(axis=0)
    norm = (1.0 / jnp.maximum(deg_in, 1.0))[:, None].astype(jnp.float32)  # g.ndata['norm']

    distance = jax.random.uniform(k_dist, (N, N))
    angle = jax.random.uniform(k_ang, (N, N))
    bin_angles = jax.random.uniform(k_feat, (N, N, 8))
    discrete = jax.random.uniform(k_disc, (N, N, 8))
    # per-edge msg extras, masked to existing edges; layout (src, dst, 18)
    ef_sd = jnp.concatenate([distance[..., None], angle[..., None],
                             bin_angles, discrete], axis=-1) * A[..., None]
    ef_sum = ef_sd.sum(axis=0).astype(jnp.float32)                        # (dst, 18)

    geom = jax.random.normal(k_geom, (N, GEOM_DIM), jnp.float32)          # g.ndata['Geometric']
    x = geom                                                              # node input features

    perm = jax.random.permutation(k_perm, N)
    num_mask = int(mask_rate * N)
    mask_nodes = perm[:num_mask]

    # graph-constant preprocessing (done once per graph, outside the kernel)
    agg = preprocess_graph(adjT, geom, ef_sum, norm)                      # (N, 24)

    fwd = jax.jit(forward)
    x_pred, x_true, n_scores = fwd(params, agg, x, mask_nodes)
    jax.block_until_ready((x_pred, x_true, n_scores))

    r_pred, r_true, r_scores = reference(params, (adjT, geom, ef_sum, norm), x, mask_nodes)
    ok = (jnp.allclose(x_pred, r_pred, atol=1e-3, rtol=1e-3)
          and jnp.allclose(x_true, r_true)
          and jnp.allclose(n_scores, r_scores, atol=1e-3, rtol=1e-3))
    assert bool(ok), "Pallas output mismatch vs reference"
    assert x_pred.shape == (num_mask, dims[0])
    assert x_true.shape == (num_mask, dims[0])
    assert n_scores.shape == (N, node_classes)
    print("KERNEL_OK")
</pallas_src>

<mosaic_0001>
module attributes {stable_mosaic.version = 11 : i64} {
  func.func @_fused_forward_kernel(%arg0: i32, %arg1: memref<64x24xf32, #tpu.memory_space<vmem>>, %arg2: memref<64x6xf32, #tpu.memory_space<vmem>>, %arg3: memref<64x1xf32, #tpu.memory_space<vmem>>, %arg4: memref<1x6xf32, #tpu.memory_space<vmem>>, %arg5: memref<6x32xf32, #tpu.memory_space<vmem>>, %arg6: memref<24x32xf32, #tpu.memory_space<vmem>>, %arg7: memref<3x32xf32, #tpu.memory_space<vmem>>, %arg8: memref<32x16xf32, #tpu.memory_space<vmem>>, %arg9: memref<24x16xf32, #tpu.memory_space<vmem>>, %arg10: memref<3x16xf32, #tpu.memory_space<vmem>>, %arg11: memref<16x5xf32, #tpu.memory_space<vmem>>, %arg12: memref<3x5xf32, #tpu.memory_space<vmem>>, %arg13: memref<16x16xf32, #tpu.memory_space<vmem>>, %arg14: memref<16x32xf32, #tpu.memory_space<vmem>>, %arg15: memref<24x32xf32, #tpu.memory_space<vmem>>, %arg16: memref<3x32xf32, #tpu.memory_space<vmem>>, %arg17: memref<32x6xf32, #tpu.memory_space<vmem>>, %arg18: memref<24x6xf32, #tpu.memory_space<vmem>>, %arg19: memref<3x6xf32, #tpu.memory_space<vmem>>, %arg20: memref<64x128xf32, #tpu.memory_space<vmem>>) attributes {dimension_semantics = [#tpu.dimension_semantics<parallel>], iteration_bounds = array<i64: 1>, scalar_prefetch = 0 : i64, scratch_operands = 0 : i64, tpu.core_type = #tpu.core_type<tc>, window_params = [{transform_indices = @transform_0, window_bounds = array<i64: 64, 24>}, {transform_indices = @transform_1, window_bounds = array<i64: 64, 6>}, {transform_indices = @transform_2, window_bounds = array<i64: 64, 1>}, {pipeline_mode = #tpu.pipeline_mode<synchronous>, transform_indices = @transform_3, window_bounds = array<i64: 1, 6>}, {pipeline_mode = #tpu.pipeline_mode<synchronous>, transform_indices = @transform_4, window_bounds = array<i64: 6, 32>}, {pipeline_mode = #tpu.pipeline_mode<synchronous>, transform_indices = @transform_5, window_bounds = array<i64: 24, 32>}, {pipeline_mode = #tpu.pipeline_mode<synchronous>, transform_indices = @transform_6, window_bounds = array<i64: 3, 32>}, {pipeline_mode = #tpu.pipeline_mode<synchronous>, transform_indices = @transform_7, window_bounds = array<i64: 32, 16>}, {pipeline_mode = #tpu.pipeline_mode<synchronous>, transform_indices = @transform_8, window_bounds = array<i64: 24, 16>}, {pipeline_mode = #tpu.pipeline_mode<synchronous>, transform_indices = @transform_9, window_bounds = array<i64: 3, 16>}, {pipeline_mode = #tpu.pipeline_mode<synchronous>, transform_indices = @transform_10, window_bounds = array<i64: 16, 5>}, {pipeline_mode = #tpu.pipeline_mode<synchronous>, transform_indices = @transform_11, window_bounds = array<i64: 3, 5>}, {pipeline_mode = #tpu.pipeline_mode<synchronous>, transform_indices = @transform_12, window_bounds = array<i64: 16, 16>}, {pipeline_mode = #tpu.pipeline_mode<synchronous>, transform_indices = @transform_13, window_bounds = array<i64: 16, 32>}, {pipeline_mode = #tpu.pipeline_mode<synchronous>, transform_indices = @transform_14, window_bounds = array<i64: 24, 32>}, {pipeline_mode = #tpu.pipeline_mode<synchronous>, transform_indices = @transform_15, window_bounds = array<i64: 3, 32>}, {pipeline_mode = #tpu.pipeline_mode<synchronous>, transform_indices = @transform_16, window_bounds = array<i64: 32, 6>}, {pipeline_mode = #tpu.pipeline_mode<synchronous>, transform_indices = @transform_17, window_bounds = array<i64: 24, 6>}, {pipeline_mode = #tpu.pipeline_mode<synchronous>, transform_indices = @transform_18, window_bounds = array<i64: 3, 6>}, {transform_indices = @transform_19, window_bounds = array<i64: 64, 128>}]} {
    %c0 = arith.constant 0 : index
    %c0_0 = arith.constant 0 : index
    %0 = vector.load %arg1[%c0, %c0_0] : memref<64x24xf32, #tpu.memory_space<vmem>>, vector<64x24xf32>
    %c0_1 = arith.constant 0 : index
    %c0_2 = arith.constant 0 : index
    %1 = vector.load %arg3[%c0_1, %c0_2] : memref<64x1xf32, #tpu.memory_space<vmem>>, vector<64x1xf32>
    %cst = arith.constant 5.000000e-01 : f32
    %2 = vector.broadcast %cst : f32 to vector<64x1xf32>
    %3 = arith.cmpf ogt, %1, %2 : vector<64x1xf32>
    %c0_3 = arith.constant 0 : index
    %c0_4 = arith.constant 0 : index
    %4 = vector.load %arg4[%c0_3, %c0_4] : memref<1x6xf32, #tpu.memory_space<vmem>>, vector<1x6xf32>
    %c0_5 = arith.constant 0 : index
    %c0_6 = arith.constant 0 : index
    %5 = vector.load %arg2[%c0_5, %c0_6] : memref<64x6xf32, #tpu.memory_space<vmem>>, vector<64x6xf32>
    %6 = vector.shape_cast %3 : vector<64x1xi1> to vector<64x1xi1>
    %7 = vector.broadcast %6 : vector<64x1xi1> to vector<64x6xi1>
    %8 = vector.shape_cast %4 : vector<1x6xf32> to vector<1x6xf32>
    %9 = vector.broadcast %8 : vector<1x6xf32> to vector<64x6xf32>
    %10 = arith.select %7, %9, %5 : vector<64x6xi1>, vector<64x6xf32>
    %c0_7 = arith.constant 0 : index
    %c0_8 = arith.constant 0 : index
    %11 = vector.load %arg7[%c0_7, %c0_8] : memref<3x32xf32, #tpu.memory_space<vmem>>, vector<3x32xf32>
    %c0_9 = arith.constant 0 : index
    %c0_10 = arith.constant 0 : index
    %12 = vector.load %arg5[%c0_9, %c0_10] : memref<6x32xf32, #tpu.memory_space<vmem>>, vector<6x32xf32>
    %cst_11 = arith.constant dense<0.000000e+00> : vector<64x32xf32>
    %13 = tpu.matmul %10, %12, %cst_11 {dimension_numbers = #tpu.dot_dimension_numbers<[1], [0], [0], [1], [0, 0, 1, 1], [], []>} : vector<64x6xf32>, vector<6x32xf32>, vector<64x32xf32> -> vector<64x32xf32>
    %c0_12 = arith.constant 0 : index
    %c0_13 = arith.constant 0 : index
    %14 = vector.load %arg6[%c0_12, %c0_13] : memref<24x32xf32, #tpu.memory_space<vmem>>, vector<24x32xf32>
    %cst_14 = arith.constant dense<0.000000e+00> : vector<64x32xf32>
    %15 = tpu.matmul %0, %14, %cst_14 {dimension_numbers = #tpu.dot_dimension_numbers<[1], [0], [0], [1], [0, 0, 1, 1], [], []>} : vector<64x24xf32>, vector<24x32xf32>, vector<64x32xf32> -> vector<64x32xf32>
    %16 = arith.addf %13, %15 : vector<64x32xf32>
    %17 = vector.extract_strided_slice %11 {offsets = [0, 0], sizes = [1, 32], strides = [1, 1]} : vector<3x32xf32> to vector<1x32xf32>
    %18 = vector.broadcast %17 : vector<1x32xf32> to vector<64x32xf32>
    %19 = arith.addf %16, %18 : vector<64x32xf32>
    %20 = vector.extract_strided_slice %11 {offsets = [1, 0], sizes = [1, 32], strides = [1, 1]} : vector<3x32xf32> to vector<1x32xf32>
    %21 = vector.extract_strided_slice %11 {offsets = [2, 0], sizes = [1, 32], strides = [1, 1]} : vector<3x32xf32> to vector<1x32xf32>
    %cst_15 = arith.constant dense<0.000000e+00> : vector<64xf32>
    %22 = vector.multi_reduction <add>, %19, %cst_15 [1] : vector<64x32xf32> to vector<64xf32>
    %23 = vector.shape_cast %22 : vector<64xf32> to vector<64x1xf32>
    %cst_16 = arith.constant 3.125000e-02 : f32
    %24 = vector.broadcast %cst_16 : f32 to vector<64x1xf32>
    %25 = arith.mulf %23, %24 : vector<64x1xf32>
    %26 = arith.mulf %19, %19 : vector<64x32xf32>
    %cst_17 = arith.constant dense<0.000000e+00> : vector<64xf32>
    %27 = vector.multi_reduction <add>, %26, %cst_17 [1] : vector<64x32xf32> to vector<64xf32>
    %28 = vector.shape_cast %27 : vector<64xf32> to vector<64x1xf32>
    %cst_18 = arith.constant 3.125000e-02 : f32
    %29 = vector.broadcast %cst_18 : f32 to vector<64x1xf32>
    %30 = arith.mulf %28, %29 : vector<64x1xf32>
    %31 = arith.mulf %25, %25 : vector<64x1xf32>
    %32 = arith.subf %30, %31 : vector<64x1xf32>
    %33 = vector.broadcast %25 : vector<64x1xf32> to vector<64x32xf32>
    %34 = arith.subf %19, %33 : vector<64x32xf32>
    %cst_19 = arith.constant 9.99999974E-6 : f32
    %35 = vector.broadcast %cst_19 : f32 to vector<64x1xf32>
    %36 = arith.addf %32, %35 : vector<64x1xf32>
    %37 = math.rsqrt %36 : vector<64x1xf32>
    %38 = vector.broadcast %37 : vector<64x1xf32> to vector<64x32xf32>
    %39 = arith.mulf %34, %38 : vector<64x32xf32>
    %40 = vector.broadcast %20 : vector<1x32xf32> to vector<64x32xf32>
    %41 = arith.mulf %39, %40 : vector<64x32xf32>
    %42 = vector.broadcast %21 : vector<1x32xf32> to vector<64x32xf32>
    %43 = arith.addf %41, %42 : vector<64x32xf32>
    %cst_20 = arith.constant 0.000000e+00 : f32
    %44 = vector.broadcast %cst_20 : f32 to vector<64x32xf32>
    %45 = arith.maximumf %43, %44 : vector<64x32xf32>
    %c0_21 = arith.constant 0 : index
    %c0_22 = arith.constant 0 : index
    %46 = vector.load %arg10[%c0_21, %c0_22] : memref<3x16xf32, #tpu.memory_space<vmem>>, vector<3x16xf32>
    %c0_23 = arith.constant 0 : index
    %c0_24 = arith.constant 0 : index
    %47 = vector.load %arg8[%c0_23, %c0_24] : memref<32x16xf32, #tpu.memory_space<vmem>>, vector<32x16xf32>
    %cst_25 = arith.constant dense<0.000000e+00> : vector<64x16xf32>
    %48 = tpu.matmul %45, %47, %cst_25 {dimension_numbers = #tpu.dot_dimension_numbers<[1], [0], [0], [1], [0, 0, 1, 1], [], []>} : vector<64x32xf32>, vector<32x16xf32>, vector<64x16xf32> -> vector<64x16xf32>
    %c0_26 = arith.constant 0 : index
    %c0_27 = arith.constant 0 : index
    %49 = vector.load %arg9[%c0_26, %c0_27] : memref<24x16xf32, #tpu.memory_space<vmem>>, vector<24x16xf32>
    %cst_28 = arith.constant dense<0.000000e+00> : vector<64x16xf32>
    %50 = tpu.matmul %0, %49, %cst_28 {dimension_numbers = #tpu.dot_dimension_numbers<[1], [0], [0], [1], [0, 0, 1, 1], [], []>} : vector<64x24xf32>, vector<24x16xf32>, vector<64x16xf32> -> vector<64x16xf32>
    %51 = arith.addf %48, %50 : vector<64x16xf32>
    %52 = vector.extract_strided_slice %46 {offsets = [0, 0], sizes = [1, 16], strides = [1, 1]} : vector<3x16xf32> to vector<1x16xf32>
    %53 = vector.broadcast %52 : vector<1x16xf32> to vector<64x16xf32>
    %54 = arith.addf %51, %53 : vector<64x16xf32>
    %55 = vector.extract_strided_slice %46 {offsets = [1, 0], sizes = [1, 16], strides = [1, 1]} : vector<3x16xf32> to vector<1x16xf32>
    %56 = vector.extract_strided_slice %46 {offsets = [2, 0], sizes = [1, 16], strides = [1, 1]} : vector<3x16xf32> to vector<1x16xf32>
    %cst_29 = arith.constant dense<0.000000e+00> : vector<64xf32>
    %57 = vector.multi_reduction <add>, %54, %cst_29 [1] : vector<64x16xf32> to vector<64xf32>
    %58 = vector.shape_cast %57 : vector<64xf32> to vector<64x1xf32>
    %cst_30 = arith.constant 6.250000e-02 : f32
    %59 = vector.broadcast %cst_30 : f32 to vector<64x1xf32>
    %60 = arith.mulf %58, %59 : vector<64x1xf32>
    %61 = arith.mulf %54, %54 : vector<64x16xf32>
    %cst_31 = arith.constant dense<0.000000e+00> : vector<64xf32>
    %62 = vector.multi_reduction <add>, %61, %cst_31 [1] : vector<64x16xf32> to vector<64xf32>
    %63 = vector.shape_cast %62 : vector<64xf32> to vector<64x1xf32>
    %cst_32 = arith.constant 6.250000e-02 : f32
    %64 = vector.broadcast %cst_32 : f32 to vector<64x1xf32>
    %65 = arith.mulf %63, %64 : vector<64x1xf32>
    %66 = arith.mulf %60, %60 : vector<64x1xf32>
    %67 = arith.subf %65, %66 : vector<64x1xf32>
    %68 = vector.broadcast %60 : vector<64x1xf32> to vector<64x16xf32>
    %69 = arith.subf %54, %68 : vector<64x16xf32>
    %cst_33 = arith.constant 9.99999974E-6 : f32
    %70 = vector.broadcast %cst_33 : f32 to vector<64x1xf32>
    %71 = arith.addf %67, %70 : vector<64x1xf32>
    %72 = math.rsqrt %71 : vector<64x1xf32>
    %73 = vector.broadcast %72 : vector<64x1xf32> to vector<64x16xf32>
    %74 = arith.mulf %69, %73 : vector<64x16xf32>
    %75 = vector.broadcast %55 : vector<1x16xf32> to vector<64x16xf32>
    %76 = arith.mulf %74, %75 : vector<64x16xf32>
    %77 = vector.broadcast %56 : vector<1x16xf32> to vector<64x16xf32>
    %78 = arith.addf %76, %77 : vector<64x16xf32>
    %cst_34 = arith.constant 0.000000e+00 : f32
    %79 = vector.broadcast %cst_34 : f32 to vector<64x16xf32>
    %80 = arith.maximumf %78, %79 : vector<64x16xf32>
    %c0_35 = arith.constant 0 : index
    %c0_36 = arith.constant 0 : index
    %81 = vector.load %arg12[%c0_35, %c0_36] : memref<3x5xf32, #tpu.memory_space<vmem>>, vector<3x5xf32>
    %c0_37 = arith.constant 0 : index
    %c0_38 = arith.constant 0 : index
    %82 = vector.load %arg11[%c0_37, %c0_38] : memref<16x5xf32, #tpu.memory_space<vmem>>, vector<16x5xf32>
    %cst_39 = arith.constant dense<0.000000e+00> : vector<64x5xf32>
    %83 = tpu.matmul %80, %82, %cst_39 {dimension_numbers = #tpu.dot_dimension_numbers<[1], [0], [0], [1], [0, 0, 1, 1], [], []>} : vector<64x16xf32>, vector<16x5xf32>, vector<64x5xf32> -> vector<64x5xf32>
    %84 = vector.extract_strided_slice %81 {offsets = [0, 0], sizes = [1, 5], strides = [1, 1]} : vector<3x5xf32> to vector<1x5xf32>
    %85 = vector.broadcast %84 : vector<1x5xf32> to vector<64x5xf32>
    %86 = arith.addf %83, %85 : vector<64x5xf32>
    %87 = vector.extract_strided_slice %81 {offsets = [1, 0], sizes = [1, 5], strides = [1, 1]} : vector<3x5xf32> to vector<1x5xf32>
    %88 = vector.extract_strided_slice %81 {offsets = [2, 0], sizes = [1, 5], strides = [1, 1]} : vector<3x5xf32> to vector<1x5xf32>
    %cst_40 = arith.constant dense<0.000000e+00> : vector<64xf32>
    %89 = vector.multi_reduction <add>, %86, %cst_40 [1] : vector<64x5xf32> to vector<64xf32>
    %90 = vector.shape_cast %89 : vector<64xf32> to vector<64x1xf32>
    %cst_41 = arith.constant 2.000000e-01 : f32
    %91 = vector.broadcast %cst_41 : f32 to vector<64x1xf32>
    %92 = arith.mulf %90, %91 : vector<64x1xf32>
    %93 = arith.mulf %86, %86 : vector<64x5xf32>
    %cst_42 = arith.constant dense<0.000000e+00> : vector<64xf32>
    %94 = vector.multi_reduction <add>, %93, %cst_42 [1] : vector<64x5xf32> to vector<64xf32>
    %95 = vector.shape_cast %94 : vector<64xf32> to vector<64x1xf32>
    %cst_43 = arith.constant 2.000000e-01 : f32
    %96 = vector.broadcast %cst_43 : f32 to vector<64x1xf32>
    %97 = arith.mulf %95, %96 : vector<64x1xf32>
    %98 = arith.mulf %92, %92 : vector<64x1xf32>
    %99 = arith.subf %97, %98 : vector<64x1xf32>
    %100 = vector.broadcast %92 : vector<64x1xf32> to vector<64x5xf32>
    %101 = arith.subf %86, %100 : vector<64x5xf32>
    %cst_44 = arith.constant 9.99999974E-6 : f32
    %102 = vector.broadcast %cst_44 : f32 to vector<64x1xf32>
    %103 = arith.addf %99, %102 : vector<64x1xf32>
    %104 = math.rsqrt %103 : vector<64x1xf32>
    %105 = vector.broadcast %104 : vector<64x1xf32> to vector<64x5xf32>
    %106 = arith.mulf %101, %105 : vector<64x5xf32>
    %107 = vector.broadcast %87 : vector<1x5xf32> to vector<64x5xf32>
    %108 = arith.mulf %106, %107 : vector<64x5xf32>
    %109 = vector.broadcast %88 : vector<1x5xf32> to vector<64x5xf32>
    %110 = arith.addf %108, %109 : vector<64x5xf32>
    %c0_45 = arith.constant 0 : index
    %c0_46 = arith.constant 0 : index
    %111 = vector.load %arg13[%c0_45, %c0_46] : memref<16x16xf32, #tpu.memory_space<vmem>>, vector<16x16xf32>
    %cst_47 = arith.constant dense<0.000000e+00> : vector<64x16xf32>
    %112 = tpu.matmul %80, %111, %cst_47 {dimension_numbers = #tpu.dot_dimension_numbers<[1], [0], [0], [1], [0, 0, 1, 1], [], []>} : vector<64x16xf32>, vector<16x16xf32>, vector<64x16xf32> -> vector<64x16xf32>
    %c0_48 = arith.constant 0 : index
    %c0_49 = arith.constant 0 : index
    %113 = vector.load %arg16[%c0_48, %c0_49] : memref<3x32xf32, #tpu.memory_space<vmem>>, vector<3x32xf32>
    %c0_50 = arith.constant 0 : index
    %c0_51 = arith.constant 0 : index
    %114 = vector.load %arg14[%c0_50, %c0_51] : memref<16x32xf32, #tpu.memory_space<vmem>>, vector<16x32xf32>
    %cst_52 = arith.constant dense<0.000000e+00> : vector<64x32xf32>
    %115 = tpu.matmul %112, %114, %cst_52 {dimension_numbers = #tpu.dot_dimension_numbers<[1], [0], [0], [1], [0, 0, 1, 1], [], []>} : vector<64x16xf32>, vector<16x32xf32>, vector<64x32xf32> -> vector<64x32xf32>
    %c0_53 = arith.constant 0 : index
    %c0_54 = arith.constant 0 : index
    %116 = vector.load %arg15[%c0_53, %c0_54] : memref<24x32xf32, #tpu.memory_space<vmem>>, vector<24x32xf32>
    %cst_55 = arith.constant dense<0.000000e+00> : vector<64x32xf32>
    %117 = tpu.matmul %0, %116, %cst_55 {dimension_numbers = #tpu.dot_dimension_numbers<[1], [0], [0], [1], [0, 0, 1, 1], [], []>} : vector<64x24xf32>, vector<24x32xf32>, vector<64x32xf32> -> vector<64x32xf32>
    %118 = arith.addf %115, %117 : vector<64x32xf32>
    %119 = vector.extract_strided_slice %113 {offsets = [0, 0], sizes = [1, 32], strides = [1, 1]} : vector<3x32xf32> to vector<1x32xf32>
    %120 = vector.broadcast %119 : vector<1x32xf32> to vector<64x32xf32>
    %121 = arith.addf %118, %120 : vector<64x32xf32>
    %122 = vector.extract_strided_slice %113 {offsets = [1, 0], sizes = [1, 32], strides = [1, 1]} : vector<3x32xf32> to vector<1x32xf32>
    %123 = vector.extract_strided_slice %113 {offsets = [2, 0], sizes = [1, 32], strides = [1, 1]} : vector<3x32xf32> to vector<1x32xf32>
    %cst_56 = arith.constant dense<0.000000e+00> : vector<64xf32>
    %124 = vector.multi_reduction <add>, %121, %cst_56 [1] : vector<64x32xf32> to vector<64xf32>
    %125 = vector.shape_cast %124 : vector<64xf32> to vector<64x1xf32>
    %cst_57 = arith.constant 3.125000e-02 : f32
    %126 = vector.broadcast %cst_57 : f32 to vector<64x1xf32>
    %127 = arith.mulf %125, %126 : vector<64x1xf32>
    %128 = arith.mulf %121, %121 : vector<64x32xf32>
    %cst_58 = arith.constant dense<0.000000e+00> : vector<64xf32>
    %129 = vector.multi_reduction <add>, %128, %cst_58 [1] : vector<64x32xf32> to vector<64xf32>
    %130 = vector.shape_cast %129 : vector<64xf32> to vector<64x1xf32>
    %cst_59 = arith.constant 3.125000e-02 : f32
    %131 = vector.broadcast %cst_59 : f32 to vector<64x1xf32>
    %132 = arith.mulf %130, %131 : vector<64x1xf32>
    %133 = arith.mulf %127, %127 : vector<64x1xf32>
    %134 = arith.subf %132, %133 : vector<64x1xf32>
    %135 = vector.broadcast %127 : vector<64x1xf32> to vector<64x32xf32>
    %136 = arith.subf %121, %135 : vector<64x32xf32>
    %cst_60 = arith.constant 9.99999974E-6 : f32
    %137 = vector.broadcast %cst_60 : f32 to vector<64x1xf32>
    %138 = arith.addf %134, %137 : vector<64x1xf32>
    %139 = math.rsqrt %138 : vector<64x1xf32>
    %140 = vector.broadcast %139 : vector<64x1xf32> to vector<64x32xf32>
    %141 = arith.mulf %136, %140 : vector<64x32xf32>
    %142 = vector.broadcast %122 : vector<1x32xf32> to vector<64x32xf32>
    %143 = arith.mulf %141, %142 : vector<64x32xf32>
    %144 = vector.broadcast %123 : vector<1x32xf32> to vector<64x32xf32>
    %145 = arith.addf %143, %144 : vector<64x32xf32>
    %cst_61 = arith.constant 0.000000e+00 : f32
    %146 = vector.broadcast %cst_61 : f32 to vector<64x32xf32>
    %147 = arith.maximumf %145, %146 : vector<64x32xf32>
    %c0_62 = arith.constant 0 : index
    %c0_63 = arith.constant 0 : index
    %148 = vector.load %arg19[%c0_62, %c0_63] : memref<3x6xf32, #tpu.memory_space<vmem>>, vector<3x6xf32>
    %c0_64 = arith.constant 0 : index
    %c0_65 = arith.constant 0 : index
    %149 = vector.load %arg17[%c0_64, %c0_65] : memref<32x6xf32, #tpu.memory_space<vmem>>, vector<32x6xf32>
    %cst_66 = arith.constant dense<0.000000e+00> : vector<64x6xf32>
    %150 = tpu.matmul %147, %149, %cst_66 {dimension_numbers = #tpu.dot_dimension_numbers<[1], [0], [0], [1], [0, 0, 1, 1], [], []>} : vector<64x32xf32>, vector<32x6xf32>, vector<64x6xf32> -> vector<64x6xf32>
    %c0_67 = arith.constant 0 : index
    %c0_68 = arith.constant 0 : index
    %151 = vector.load %arg18[%c0_67, %c0_68] : memref<24x6xf32, #tpu.memory_space<vmem>>, vector<24x6xf32>
    %cst_69 = arith.constant dense<0.000000e+00> : vector<64x6xf32>
    %152 = tpu.matmul %0, %151, %cst_69 {dimension_numbers = #tpu.dot_dimension_numbers<[1], [0], [0], [1], [0, 0, 1, 1], [], []>} : vector<64x24xf32>, vector<24x6xf32>, vector<64x6xf32> -> vector<64x6xf32>
    %153 = arith.addf %150, %152 : vector<64x6xf32>
    %154 = vector.extract_strided_slice %148 {offsets = [0, 0], sizes = [1, 6], strides = [1, 1]} : vector<3x6xf32> to vector<1x6xf32>
    %155 = vector.broadcast %154 : vector<1x6xf32> to vector<64x6xf32>
    %156 = arith.addf %153, %155 : vector<64x6xf32>
    %157 = vector.extract_strided_slice %148 {offsets = [1, 0], sizes = [1, 6], strides = [1, 1]} : vector<3x6xf32> to vector<1x6xf32>
    %158 = vector.extract_strided_slice %148 {offsets = [2, 0], sizes = [1, 6], strides = [1, 1]} : vector<3x6xf32> to vector<1x6xf32>
    %cst_70 = arith.constant dense<0.000000e+00> : vector<64xf32>
    %159 = vector.multi_reduction <add>, %156, %cst_70 [1] : vector<64x6xf32> to vector<64xf32>
    %160 = vector.shape_cast %159 : vector<64xf32> to vector<64x1xf32>
    %cst_71 = arith.constant 0.166666672 : f32
    %161 = vector.broadcast %cst_71 : f32 to vector<64x1xf32>
    %162 = arith.mulf %160, %161 : vector<64x1xf32>
    %163 = arith.mulf %156, %156 : vector<64x6xf32>
    %cst_72 = arith.constant dense<0.000000e+00> : vector<64xf32>
    %164 = vector.multi_reduction <add>, %163, %cst_72 [1] : vector<64x6xf32> to vector<64xf32>
    %165 = vector.shape_cast %164 : vector<64xf32> to vector<64x1xf32>
    %cst_73 = arith.constant 0.166666672 : f32
    %166 = vector.broadcast %cst_73 : f32 to vector<64x1xf32>
    %167 = arith.mulf %165, %166 : vector<64x1xf32>
    %168 = arith.mulf %162, %162 : vector<64x1xf32>
    %169 = arith.subf %167, %168 : vector<64x1xf32>
    %170 = vector.broadcast %162 : vector<64x1xf32> to vector<64x6xf32>
    %171 = arith.subf %156, %170 : vector<64x6xf32>
    %cst_74 = arith.constant 9.99999974E-6 : f32
    %172 = vector.broadcast %cst_74 : f32 to vector<64x1xf32>
    %173 = arith.addf %169, %172 : vector<64x1xf32>
    %174 = math.rsqrt %173 : vector<64x1xf32>
    %175 = vector.broadcast %174 : vector<64x1xf32> to vector<64x6xf32>
    %176 = arith.mulf %171, %175 : vector<64x6xf32>
    %177 = vector.broadcast %157 : vector<1x6xf32> to vector<64x6xf32>
    %178 = arith.mulf %176, %177 : vector<64x6xf32>
    %179 = vector.broadcast %158 : vector<1x6xf32> to vector<64x6xf32>
    %180 = arith.addf %178, %179 : vector<64x6xf32>
    %cst_75 = arith.constant 0.000000e+00 : f32
    %181 = vector.broadcast %cst_75 : f32 to vector<64x6xf32>
    %182 = arith.maximumf %180, %181 : vector<64x6xf32>
    %cst_76 = arith.constant 0.000000e+00 : f32
    %183 = vector.broadcast %cst_76 : f32 to vector<64x117xf32>
    %184 = tpu.concatenate %182, %110, %183 in 1 : vector<64x6xf32>, vector<64x5xf32>, vector<64x117xf32> -> vector<64x128xf32>
    %c0_77 = arith.constant 0 : index
    %c0_78 = arith.constant 0 : index
    %185 = vector.load %arg20[%c0_77, %c0_78] : memref<64x128xf32, #tpu.memory_space<vmem>>, vector<64x128xf32>
    tpu.vector_store %arg20[%c0_77, %c0_78], %184 {strides = array<i32>} : memref<64x128xf32, #tpu.memory_space<vmem>>, vector<64x128xf32>,
    return
  }
  func.func @transform_0(%arg0: i32) -> (i32, i32) {
    %c0_i32 = arith.constant 0 : i32
    %c0_i32_0 = arith.constant 0 : i32
    return %arg0, %c0_i32 : i32, i32
  }
  func.func @transform_1(%arg0: i32) -> (i32, i32) {
    %c0_i32 = arith.constant 0 : i32
    %c0_i32_0 = arith.constant 0 : i32
    return %arg0, %c0_i32 : i32, i32
  }
  func.func @transform_2(%arg0: i32) -> (i32, i32) {
    %c0_i32 = arith.constant 0 : i32
    %c0_i32_0 = arith.constant 0 : i32
    return %arg0, %c0_i32 : i32, i32
  }
  func.func @transform_3(%arg0: i32) -> (i32, i32) {
    %c0_i32 = arith.constant 0 : i32
    %c0_i32_0 = arith.constant 0 : i32
    %c0_i32_1 = arith.constant 0 : i32
    return %c0_i32, %c0_i32_0 : i32, i32
  }
  func.func @transform_4(%arg0: i32) -> (i32, i32) {
    %c0_i32 = arith.constant 0 : i32
    %c0_i32_0 = arith.constant 0 : i32
    %c0_i32_1 = arith.constant 0 : i32
    return %c0_i32, %c0_i32_0 : i32, i32
  }
  func.func @transform_5(%arg0: i32) -> (i32, i32) {
    %c0_i32 = arith.constant 0 : i32
    %c0_i32_0 = arith.constant 0 : i32
    %c0_i32_1 = arith.constant 0 : i32
    return %c0_i32, %c0_i32_0 : i32, i32
  }
  func.func @transform_6(%arg0: i32) -> (i32, i32) {
    %c0_i32 = arith.constant 0 : i32
    %c0_i32_0 = arith.constant 0 : i32
    %c0_i32_1 = arith.constant 0 : i32
    return %c0_i32, %c0_i32_0 : i32, i32
  }
  func.func @transform_7(%arg0: i32) -> (i32, i32) {
    %c0_i32 = arith.constant 0 : i32
    %c0_i32_0 = arith.constant 0 : i32
    %c0_i32_1 = arith.constant 0 : i32
    return %c0_i32, %c0_i32_0 : i32, i32
  }
  func.func @transform_8(%arg0: i32) -> (i32, i32) {
    %c0_i32 = arith.constant 0 : i32
    %c0_i32_0 = arith.constant 0 : i32
    %c0_i32_1 = arith.constant 0 : i32
    return %c0_i32, %c0_i32_0 : i32, i32
  }
  func.func @transform_9(%arg0: i32) -> (i32, i32) {
    %c0_i32 = arith.constant 0 : i32
    %c0_i32_0 = arith.constant 0 : i32
    %c0_i32_1 = arith.constant 0 : i32
    return %c0_i32, %c0_i32_0 : i32, i32
  }
  func.func @transform_10(%arg0: i32) -> (i32, i32) {
    %c0_i32 = arith.constant 0 : i32
    %c0_i32_0 = arith.constant 0 : i32
    %c0_i32_1 = arith.constant 0 : i32
    return %c0_i32, %c0_i32_0 : i32, i32
  }
  func.func @transform_11(%arg0: i32) -> (i32, i32) {
    %c0_i32 = arith.constant 0 : i32
    %c0_i32_0 = arith.constant 0 : i32
    %c0_i32_1 = arith.constant 0 : i32
    return %c0_i32, %c0_i32_0 : i32, i32
  }
  func.func @transform_12(%arg0: i32) -> (i32, i32) {
    %c0_i32 = arith.constant 0 : i32
    %c0_i32_0 = arith.constant 0 : i32
    %c0_i32_1 = arith.constant 0 : i32
    return %c0_i32, %c0_i32_0 : i32, i32
  }
  func.func @transform_13(%arg0: i32) -> (i32, i32) {
    %c0_i32 = arith.constant 0 : i32
    %c0_i32_0 = arith.constant 0 : i32
    %c0_i32_1 = arith.constant 0 : i32
    return %c0_i32, %c0_i32_0 : i32, i32
  }
  func.func @transform_14(%arg0: i32) -> (i32, i32) {
    %c0_i32 = arith.constant 0 : i32
    %c0_i32_0 = arith.constant 0 : i32
    %c0_i32_1 = arith.constant 0 : i32
    return %c0_i32, %c0_i32_0 : i32, i32
  }
  func.func @transform_15(%arg0: i32) -> (i32, i32) {
    %c0_i32 = arith.constant 0 : i32
    %c0_i32_0 = arith.constant 0 : i32
    %c0_i32_1 = arith.constant 0 : i32
    return %c0_i32, %c0_i32_0 : i32, i32
  }
  func.func @transform_16(%arg0: i32) -> (i32, i32) {
    %c0_i32 = arith.constant 0 : i32
    %c0_i32_0 = arith.constant 0 : i32
    %c0_i32_1 = arith.constant 0 : i32
    return %c0_i32, %c0_i32_0 : i32, i32
  }
  func.func @transform_17(%arg0: i32) -> (i32, i32) {
    %c0_i32 = arith.constant 0 : i32
    %c0_i32_0 = arith.constant 0 : i32
    %c0_i32_1 = arith.constant 0 : i32
    return %c0_i32, %c0_i32_0 : i32, i32
  }
  func.func @transform_18(%arg0: i32) -> (i32, i32) {
    %c0_i32 = arith.constant 0 : i32
    %c0_i32_0 = arith.constant 0 : i32
    %c0_i32_1 = arith.constant 0 : i32
    return %c0_i32, %c0_i32_0 : i32, i32
  }
  func.func @transform_19(%arg0: i32) -> (i32, i32) {
    %c0_i32 = arith.constant 0 : i32
    %c0_i32_0 = arith.constant 0 : i32
    return %arg0, %c0_i32 : i32, i32
  }
}

</mosaic_0001>

<bundles_post_ra>
// kernel: forward.1
= control target key start
LH: loop header
LB: loop body
LE: loop exit
PB: predicated region body
PF: predicated region fallthrough
CT: control target
= control target key end

     0   :  { %v2100_v0 = vmov 0   ;;  %vm242_vm8 = vcmask 1045504   ;;  %vm151_vm9 = vcmask 195584   ;;  %vm217_vm11 = vcmask 48128   ;;  %s3393_s2 = inlined_call_operand.vmem [shape: f32[64,1], index: 2, kind: input, shape index: {}]   ;;  %s3394_s5 = inlined_call_operand.vmem [shape: f32[24,32], index: 5, kind: input, shape index: {}]   ;;  %s3395_s3 = inlined_call_operand.vmem [shape: f32[1,6], index: 3, kind: input, shape index: {}]   ;;  %s3396_s4 = inlined_call_operand.vmem [shape: f32[6,32], index: 4, kind: input, shape index: {}]   ;;  %s3397_s0 = inlined_call_operand.vmem [shape: f32[64,24], index: 0, kind: input, shape index: {}]   ;;  %s3398_s1 = inlined_call_operand.vmem [shape: f32[64,6], index: 1, kind: input, shape index: {}]   ;;  %s3399_s6 = inlined_call_operand.vmem [shape: f32[3,32], index: 6, kind: input, shape index: {}]   ;;  %s3400_s8 = inlined_call_operand.vmem [shape: f32[24,16], index: 8, kind: input, shape index: {}]   ;;  %s3401_s7 = inlined_call_operand.vmem [shape: f32[32,16], index: 7, kind: input, shape index: {}]   ;;  %s3402_s9 = inlined_call_operand.vmem [shape: f32[3,16], index: 9, kind: input, shape index: {}]   ;;  %s3403_s12 = inlined_call_operand.vmem [shape: f32[16,16], index: 12, kind: input, shape index: {}]   ;;  %s3404_s10 = inlined_call_operand.vmem [shape: f32[16,5], index: 10, kind: input, shape index: {}]   ;;  %s3405_s14 = inlined_call_operand.vmem [shape: f32[24,32], index: 14, kind: input, shape index: {}]   ;;  %s3406_s13 = inlined_call_operand.vmem [shape: f32[16,32], index: 13, kind: input, shape index: {}]   ;;  %s3407_s15 = inlined_call_operand.vmem [shape: f32[3,32], index: 15, kind: input, shape index: {}]   ;;  %s3408_s11 = inlined_call_operand.vmem [shape: f32[3,5], index: 11, kind: input, shape index: {}]   ;;  %s3409_s17 = inlined_call_operand.vmem [shape: f32[24,6], index: 17, kind: input, shape index: {}]   ;;  %s3410_s16 = inlined_call_operand.vmem [shape: f32[32,6], index: 16, kind: input, shape index: {}]   ;;  %s3411_s18 = inlined_call_operand.vmem [shape: f32[3,6], index: 18, kind: input, shape index: {}]   ;;  %s3412_s19 = inlined_call_operand.vmem [shape: f32[64,128], index: 19, kind: output, shape index: {}]  }
   0x1   :  { %3415 = sst [smem:[#allocation2_spill]] %s3393_s2  ;;  %2008 = vset.pattern.permute.xlu0 %v2100_v0  ;;  %2009 = vset.pattern.permute.xlu1 %v2100_v0  ;;  %v2241_v21 = vld [vmem:[%s3397_s0] sm:$0xff]  ;;  %v2255_v23 = vld [vmem:[%s3397_s0 + $0x8] sm:$0xff]  ;;  %v2272_v27 = vld [vmem:[%s3397_s0 + $0x10] sm:$0xff] }
   0x2   :  { %3416 = sst [smem:[#allocation3_spill]] %s3394_s5  ;;  %2010 = vset.pattern.permute.xlu2 %v2100_v0  ;;  %v2246_v22 = vld [vmem:[%s3397_s0 + $0x20] sm:$0xff]  ;;  %v2260_v24 = vld [vmem:[%s3397_s0 + $0x28] sm:$0xff]  ;;  %v2277_v28 = vld [vmem:[%s3397_s0 + $0x30] sm:$0xff] }
   0x3   :  { %3417 = sst [smem:[#allocation4_spill]] %s3395_s3  ;;  %v92_v26 = vld [vmem:[%s3398_s1 + $0x28] sm:$0xff]  ;;  %v2290_v32 = vld [vmem:[%s3397_s0 + $0x18] sm:$0xff]  ;;  %v87_v34 = vld [vmem:[%s3398_s1] sm:$0xff] }
   0x4   :  { %3418 = sst [smem:[#allocation5_spill]] %s3396_s4  ;;  %v2295_v33 = vld [vmem:[%s3397_s0 + $0x38] sm:$0xff]  ;;  %v88_v38 = vld [vmem:[%s3398_s1 + $0x8] sm:$0xff]  ;;  %v89_v42 = vld [vmem:[%s3398_s1 + $0x10] sm:$0xff] }
   0x5   :  { %s3419_s20 = sld [smem:[#allocation2_spill]]  ;;  %v93_v43 = vld [vmem:[%s3398_s1 + $0x30] sm:$0xff]  ;;  %v90_v48 = vld [vmem:[%s3398_s1 + $0x18] sm:$0xff]  ;;  %v91_v52 = vld [vmem:[%s3398_s1 + $0x20] sm:$0xff] }
   0x6   :  { %s3420_s28 = sld [smem:[#allocation3_spill]]  ;;  %v94_v49 = vld [vmem:[%s3398_s1 + $0x38] sm:$0xff]  ;;  %v2332_v55 = vld [vmem:[%s3399_s6] sm:$0x7] }
   0x7   :  { %s3421_s27 = sld [smem:[#allocation5_spill]]  ;;  %v2335_v56 = vperm.slane %v2332_v55, 0 }
   0x8   :  { %s3422_s29 = sld [smem:[#allocation4_spill]] }
   0xb   :  { %v70_v1 = vld [vmem:[%s3419_s20] sm:$0xff]  ;;  %v72_v2 = vld [vmem:[%s3419_s20 + $0x10] sm:$0xff]  ;;  %v71_v5 = vld [vmem:[%s3419_s20 + $0x8] sm:$0xff] }
   0xc   :  { %vm78_vm0 = vcmp.gt.f32.partialorder %v70_v1, 0.5  ;;  %vm80_vm1 = vcmp.gt.f32.partialorder %v72_v2, 0.5  ;;  %v73_v6 = vld [vmem:[%s3419_s20 + $0x18] sm:$0xff]  ;;  %v74_v7 = vld [vmem:[%s3419_s20 + $0x20] sm:$0xff]  ;;  %v150_v8 = vld [vmem:[%s3420_s28 + $0x10] sm:$0xff]  ;;  %vm79_vm3 = vcmp.gt.f32.partialorder %v71_v5, 0.5 }
   0xd   :  { %v95_v3 = vsel %vm78_vm0, 1, %v2100_v0  ;;  %v97_v4 = vsel %vm80_vm1, 1, %v2100_v0  ;;  %vm82_vm2 = vcmp.gt.f32.partialorder %v74_v7, 0.5  ;;  %v149_v9 = vld [vmem:[%s3420_s28 + $0x8] sm:$0xff]  ;;  %189 = vmatpush.msra.mxu0 %v150_v8  ;;  %2002 = vmatpush.msra.mxu2 %v150_v8  ;;  %vm81_vm4 = vcmp.gt.f32.partialorder %v73_v6, 0.5  ;;  %v76_v14 = vld [vmem:[%s3419_s20 + $0x30] sm:$0xff] }
   0xe   :  { %104 = vperm.xlu0 %2008, %v95_v3   ;;  %110 = vperm.xlu1 %2009, %v97_v4   ;;  %v99_v10 = vsel %vm82_vm2, 1, %v2100_v0  ;;  %v75_v11 = vld [vmem:[%s3419_s20 + $0x28] sm:$0xff]  ;;  %v96_v12 = vsel %vm79_vm3, 1, %v2100_v0  ;;  %v98_v13 = vsel %vm81_vm4, 1, %v2100_v0  ;;  %v77_v15 = vld [vmem:[%s3419_s20 + $0x38] sm:$0xff]  ;;  %vm84_vm6 = vcmp.gt.f32.partialorder %v76_v14, 0.5 }
   0xf   :  { %116 = vperm.xlu2 %2010, %v99_v10   ;;  %190 = vmatpush.msra.mxu0 %v149_v9  ;;  %vm83_vm5 = vcmp.gt.f32.partialorder %v75_v11, 0.5  ;;  %vm85_vm7 = vcmp.gt.f32.partialorder %v77_v15, 0.5  ;;  %v101_v17 = vsel %vm84_vm6, 1, %v2100_v0  ;;  %v148_v19 = vld [vmem:[%s3420_s28] sm:$0xff]  ;;  %vm296_vm3 = vcmask 261120  }
  0x10   :  { %2003 = vmatpush.msra.mxu2 %v149_v9  ;;  %v100_v16 = vsel %vm83_vm5, 1, %v2100_v0  ;;  %v102_v18 = vsel %vm85_vm7, 1, %v2100_v0  ;;  %v147_v20 = vld [vmem:[%s3421_s27] sm:$0x3f] }
  0x11   :  { %191 = vmatpush.msra.mxu0 %v148_v19  ;;  %1929 = vmatpush.msk.msra.mxu1 %vm242_vm8, %v147_v20  ;;  %v2011_v29 = vld [vmem:[%s3422_s29] ss:$0 sm:$0xff] }
  0x12   :  { %2004 = vmatpush.msra.mxu2 %v148_v19  ;;  %1921 = vmatmul.msk.f32.vlgmr.msra.gmra.mxu0 %vm151_vm9, %v2241_v21 }
  0x13   :  { %1925 = vmatmul.msk.f32.vlgmr.msra.gmra.mxu2 %vm151_vm9, %v2246_v22  ;;  %2005 = vmatpush.msk.msra.mxu3 %vm242_vm8, %v147_v20 }
  0x16   :  { %107 = vperm.xlu0 %2008, %v96_v12   ;;  %113 = vperm.xlu1 %2009, %v98_v13  }
  0x17   :  { %119 = vperm.xlu2 %2010, %v100_v16  }
  0x1a   :  { %1922 = vmatmul.msk.f32.gmra.mxu0 %vm151_vm9, %v2255_v23 }
  0x1b   :  { %1926 = vmatmul.msk.f32.gmra.mxu2 %vm151_vm9, %v2260_v24 }
  0x1e   :  { %122 = vperm.xlu0 %2008, %v101_v17   ;;  %125 = vperm.xlu1 %2009, %v102_v18  }
  0x22   :  { %1923 = vmatmul.msk.f32.gmra.mxu0 %vm151_vm9, %v2272_v27 }
  0x23   :  { %1927 = vmatmul.msk.f32.gmra.mxu2 %vm151_vm9, %v2277_v28 }
  0x2a   :  { %1924 = vmatmul.msk.f32.gmra.mxu0 %vm151_vm9, %v2290_v32 }
  0x2b   :  { %1928 = vmatmul.msk.f32.gmra.mxu2 %vm151_vm9, %v2295_v33 }
  0x69   :  { %v117_v25 = vpop.permute.xlu2 %116 }
  0x6a   :  { %vm131_vm2 = vcmp.eq.s32.totalorder %v117_v25, 1 }
  0x6b   :  { %v142_v53 = vsel %vm131_vm2, %v2011_v29, %v91_v52 }
  0x71   :  { %v120_v30 = vpop.permute.xlu2 %119 }
  0x72   :  { %vm132_vm10 = vcmp.eq.s32.totalorder %v120_v30, 1 }
  0x73   :  { %v143_v31 = vsel %vm132_vm10, %v2011_v29, %v92_v26 }
  0x74   :  { %1935 = vmatmul.msk.f32.vlgmr.msra.gmra.mxu3 %vm217_vm11, %v143_v31 }
  0x80   :  { %v105_v35 = vpop.permute.xlu0 %104  ;;  %v111_v36 = vpop.permute.xlu1 %110 }
  0x81   :  { %vm127_vm12 = vcmp.eq.s32.totalorder %v105_v35, 1  ;;  %vm129_vm14 = vcmp.eq.s32.totalorder %v111_v36, 1 }
  0x82   :  { %v138_v37 = vsel %vm127_vm12, %v2011_v29, %v87_v34  ;;  %v140_v45 = vsel %vm129_vm14, %v2011_v29, %v89_v42 }
  0x83   :  { %1930 = vmatmul.msk.f32.vlgmr.msra.gmra.mxu1 %vm217_vm11, %v138_v37 }
  0x88   :  { %v108_v39 = vpop.permute.xlu0 %107  ;;  %v114_v40 = vpop.permute.xlu1 %113 }
  0x89   :  { %vm128_vm13 = vcmp.eq.s32.totalorder %v108_v39, 1  ;;  %vm130_vm0 = vcmp.eq.s32.totalorder %v114_v40, 1 }
  0x8a   :  { %v139_v41 = vsel %vm128_vm13, %v2011_v29, %v88_v38  ;;  %v141_v50 = vsel %vm130_vm0, %v2011_v29, %v90_v48 }
  0x8b   :  { %1931 = vmatmul.msk.f32.gmra.mxu1 %vm217_vm11, %v139_v41 }
  0x8f   :  { %v193_v54 = vpop.f32.mrf.mxu0 }
  0x90   :  { %v123_v44 = vpop.permute.xlu0 %122  ;;  %v126_v47 = vpop.permute.xlu1 %125 }
  0x91   :  { %vm133_vm15 = vcmp.eq.s32.totalorder %v123_v44, 1  ;;  %vm134_vm1 = vcmp.eq.s32.totalorder %v126_v47, 1 }
  0x92   :  { %v144_v46 = vsel %vm133_vm15, %v2011_v29, %v93_v43  ;;  %v145_v51 = vsel %vm134_vm1, %v2011_v29, %v94_v49 }
  0x93   :  { %1932 = vmatmul.msk.f32.gmra.mxu1 %vm217_vm11, %v140_v45  ;;  %1936 = vmatmul.msk.f32.gmra.mxu3 %vm217_vm11, %v144_v46 }
  0x96   :  { %v205_v2 = vpop.f32.mrf.mxu2 }
  0x97   :  { %v196_v59 = vpop.f32.mrf.mxu0 }
  0x9b   :  { %1933 = vmatmul.msk.f32.gmra.mxu1 %vm217_vm11, %v141_v50  ;;  %1937 = vmatmul.msk.f32.gmra.mxu3 %vm217_vm11, %v145_v51 }
  0x9e   :  { %v208_v11 = vpop.f32.mrf.mxu2 }
  0x9f   :  { %v199_v4 = vpop.f32.mrf.mxu0 }
  0xa3   :  { %1934 = vmatmul.msk.f32.gmra.mxu1 %vm217_vm11, %v142_v53 }
  0xa6   :  { %v211_v29 = vpop.f32.mrf.mxu2 }
  0xa7   :  { %v202_v15 = vpop.f32.mrf.mxu0 }
  0xae   :  { %v214_v44 = vpop.f32.mrf.mxu2 }
  0xf7   :  { %v278_v12 = vpop.f32.mrf.mxu3 }
  0xf8   :  { %v279_v20 = vadd.f32 %v278_v12, %v208_v11 }
  0xfa   :  { %v2370_v35 = vadd.f32 %v2335_v56, %v279_v20 }
  0xfc   :  { %v312_v40 = vsel %vm296_vm3, %v2370_v35, 0.0  ;;  %v334_v46 = vmul.f32 %v2370_v35, %v2370_v35 }
  0xfe   :  { %v352_v49 = vsel %vm296_vm3, %v334_v46, 0.0 }
 0x100   :  { %v263_v57 = vpop.f32.mrf.mxu1 }
 0x101   :  { %v264_v58 = vadd.f32 %v263_v57, %v193_v54 }
 0x103   :  { %v2338_v60 = vadd.f32 %v2335_v56, %v264_v58  ;;  %v519_v58 = vld [vmem:[%s3401_s7 + $0x18] sm:$0xff] }
 0x104   :  { %600 = vmatpush.msrb.mxu3 %v519_v58 }
 0x105   :  { %v297_v61 = vsel %vm296_vm3, %v2338_v60, 0.0  ;;  %v329_v62 = vmul.f32 %v2338_v60, %v2338_v60 }
 0x106   :  { %298 = vadd.xlane.f32.xlu2 %v297_v61  ;;  %v521_v61 = vld [vmem:[%s3400_s8 + $0x8] sm:$0xff] }
 0x107   :  { %v337_v63 = vsel %vm296_vm3, %v329_v62, 0.0 }
 0x108   :  { %v266_v0 = vpop.f32.mrf.mxu1  ;;  %338 = vadd.xlane.f32.xlu0 %v337_v63  ;;  %v517_v63 = vld [vmem:[%s3401_s7 + $0x8] sm:$0xff] }
 0x109   :  { %v267_v1 = vadd.f32 %v266_v0, %v196_v59  ;;  %v518_v59 = vld [vmem:[%s3401_s7 + $0x10] sm:$0xff] }
 0x10a   :  { %601 = vmatpush.msrb.mxu3 %v518_v59 }
 0x10b   :  { %v2346_v3 = vadd.f32 %v2335_v56, %v267_v1 }
 0x10c   :  { %602 = vmatpush.msrb.mxu3 %v517_v63 }
 0x10d   :  { %v300_v5 = vsel %vm296_vm3, %v2346_v3, 0.0  ;;  %v330_v6 = vmul.f32 %v2346_v3, %v2346_v3 }
 0x10e   :  { %301 = vadd.xlane.f32.xlu1 %v300_v5 }
 0x10f   :  { %v340_v7 = vsel %vm296_vm3, %v330_v6, 0.0 }
 0x110   :  { %v269_v8 = vpop.f32.mrf.mxu1  ;;  %341 = vadd.xlane.f32.xlu2 %v340_v7 }
 0x111   :  { %v270_v9 = vadd.f32 %v269_v8, %v199_v4  ;;  %v516_v4 = vld [vmem:[%s3401_s7] sm:$0xff] }
 0x112   :  { %603 = vmatpush.msrb.mxu3 %v516_v4 }
 0x113   :  { %v2354_v10 = vadd.f32 %v2335_v56, %v270_v9 }
 0x115   :  { %v303_v13 = vsel %vm296_vm3, %v2354_v10, 0.0  ;;  %v331_v14 = vmul.f32 %v2354_v10, %v2354_v10 }
 0x116   :  { %v281_v30 = vpop.f32.mrf.mxu3 }
 0x117   :  { %v343_v16 = vsel %vm296_vm3, %v331_v14, 0.0  ;;  %v282_v37 = vadd.f32 %v281_v30, %v211_v29 }
 0x118   :  { %v272_v17 = vpop.f32.mrf.mxu1  ;;  %304 = vadd.xlane.f32.xlu2 %v303_v13  ;;  %344 = vadd.xlane.f32.xlu0 %v343_v16 }
 0x119   :  { %v273_v18 = vadd.f32 %v272_v17, %v202_v15  ;;  %v2382_v42 = vadd.f32 %v2335_v56, %v282_v37 }
 0x11b   :  { %v2362_v19 = vadd.f32 %v2335_v56, %v273_v18  ;;  %v335_v48 = vmul.f32 %v2382_v42, %v2382_v42  ;;  %v315_v52 = vsel %vm296_vm3, %v2382_v42, 0.0 }
 0x11d   :  { %v306_v25 = vsel %vm296_vm3, %v2362_v19, 0.0  ;;  %v332_v26 = vmul.f32 %v2362_v19, %v2362_v19  ;;  %v355_v51 = vsel %vm296_vm3, %v335_v48, 0.0  ;;  %v2443_v48 = vperm.slane %v2332_v55, 2 }
 0x11e   :  { %307 = vadd.xlane.f32.xlu1 %v306_v25  ;;  %v284_v45 = vpop.f32.mrf.mxu3 }
 0x11f   :  { %v346_v31 = vsel %vm296_vm3, %v332_v26, 0.0  ;;  %v285_v47 = vadd.f32 %v284_v45, %v214_v44 }
 0x120   :  { %v275_v34 = vpop.f32.mrf.mxu1  ;;  %347 = vadd.xlane.f32.xlu2 %v346_v31 }
 0x121   :  { %v276_v36 = vadd.f32 %v275_v34, %v205_v2  ;;  %v2391_v50 = vadd.f32 %v2335_v56, %v285_v47  ;;  %v520_v2 = vld [vmem:[%s3400_s8] sm:$0xff] }
 0x123   :  { %v2373_v38 = vadd.f32 %v2335_v56, %v276_v36  ;;  %v336_v53 = vmul.f32 %v2391_v50, %v2391_v50  ;;  %v318_v54 = vsel %vm296_vm3, %v2391_v50, 0.0  ;;  %v522_v56 = vld [vmem:[%s3400_s8 + $0x10] sm:$0xff] }
 0x124   :  { %536 = vmatpush.msrb.mxu2 %v522_v56 }
 0x125   :  { %v309_v39 = vsel %vm296_vm3, %v2373_v38, 0.0  ;;  %v333_v41 = vmul.f32 %v2373_v38, %v2373_v38  ;;  %v358_v57 = vsel %vm296_vm3, %v336_v53, 0.0 }
 0x126   :  { %310 = vadd.xlane.f32.xlu0 %v309_v39  ;;  %537 = vmatpush.msrb.mxu2 %v521_v61 }
 0x127   :  { %v349_v43 = vsel %vm296_vm3, %v333_v41, 0.0  ;;  %v2437_v41 = vperm.slane %v2332_v55, 1 }
 0x128   :  { %313 = vadd.xlane.f32.xlu2 %v312_v40  ;;  %350 = vadd.xlane.f32.xlu1 %v349_v43 }
 0x129   :  { %538 = vmatpush.msrb.mxu2 %v520_v2 }
 0x12a   :  { %1938 = vmatmul.msk.f32.vlgmr.msrb.gmra.mxu2 %vm151_vm9, %v2241_v21 }
 0x12e   :  { %353 = vadd.xlane.f32.xlu0 %v352_v49 }
 0x130   :  { %356 = vadd.xlane.f32.xlu2 %v355_v51  ;;  %316 = vadd.xlane.f32.xlu1 %v315_v52 }
 0x132   :  { %1939 = vmatmul.msk.f32.gmra.mxu2 %vm151_vm9, %v2255_v23 }
 0x136   :  { %319 = vadd.xlane.f32.xlu0 %v318_v54 }
 0x138   :  { %359 = vadd.xlane.f32.xlu1 %v358_v57 }
 0x13a   :  { %1940 = vmatmul.msk.f32.gmra.mxu2 %vm151_vm9, %v2272_v27 }
 0x142   :  { %1941 = vmatmul.msk.f32.gmra.mxu2 %vm151_vm9, %v2290_v32 }
 0x14a   :  { %1942 = vmatmul.msk.f32.gmra.mxu2 %vm151_vm9, %v2246_v22 }
 0x152   :  { %1943 = vmatmul.msk.f32.gmra.mxu2 %vm151_vm9, %v2260_v24 }
 0x15a   :  { %1944 = vmatmul.msk.f32.gmra.mxu2 %vm151_vm9, %v2277_v28 }
 0x162   :  { %1945 = vmatmul.msk.f32.gmra.mxu2 %vm151_vm9, %v2295_v33 }
 0x179   :  { %v299_v62 = vpop.xlane.xlu2 %298 }
 0x17a   :  { %v321_v0 = vmul.f32 0.03125, %v299_v62 }
 0x17b   :  { %v339_v1 = vpop.xlane.xlu0 %338 }
 0x17c   :  { %v369_v5 = vmul.f32 %v321_v0, %v321_v0  ;;  %v361_v6 = vmul.f32 0.03125, %v339_v1  ;;  %v385_v43 = vsub.f32 %v2338_v60, %v321_v0 }
 0x17e   :  { %v377_v7 = vsub.f32 %v361_v6, %v369_v5 }
 0x180   :  { %v393_v8 = vadd.f32 1e-05, %v377_v7 }
 0x181   :  { %v302_v9 = vpop.xlane.xlu1 %301 }
 0x182   :  { %2012 = vrsqrt.f32 %v393_v8  ;;  %v2424_v11 = vmul.f32 0.03125, %v302_v9  ;;  %vm407_vm5 = vweird.f32 %v393_v8 }
 0x183   :  { %v342_v12 = vpop.xlane.xlu2 %341 }
 0x184   :  { %v370_v13 = vmul.f32 %v2424_v11, %v2424_v11  ;;  %v362_v14 = vmul.f32 0.03125, %v342_v12  ;;  %v386_v2 = vsub.f32 %v2346_v3, %v2424_v11 }
 0x186   :  { %v378_v15 = vsub.f32 %v362_v14, %v370_v13 }
 0x188   :  { %v2013_v16 = vpop.eup %2012  ;;  %v394_v17 = vadd.f32 1e-05, %v378_v15 }
 0x189   :  { %v402_v18 = vmul.f32 %v2013_v16, %v393_v8  ;;  %vm408_vm4 = vweird.f32 %v2013_v16 }
 0x18a   :  { %2014 = vrsqrt.f32 %v394_v17  ;;  %vm409_vm6 = vmor %vm407_vm5, %vm408_vm4  ;;  %vm417_vm8 = vweird.f32 %v394_v17 }
 0x18b   :  { %v403_v21 = vmul.f32 %v2013_v16, %v402_v18  ;;  %v305_v20 = vpop.xlane.xlu2 %304  ;;  %v345_v25 = vpop.xlane.xlu0 %344 }
 0x18c   :  { %v2430_v26 = vmul.f32 0.03125, %v305_v20  ;;  %v363_v29 = vmul.f32 0.03125, %v345_v25 }
 0x18d   :  { %v404_v30 = vmul.f32 0.5, %v403_v21 }
 0x18e   :  { %v371_v31 = vmul.f32 %v2430_v26, %v2430_v26 }
 0x18f   :  { %v405_v34 = vsub.f32 1.5, %v404_v30  ;;  %v387_v30 = vsub.f32 %v2354_v10, %v2430_v26 }
 0x190   :  { %v2015_v23 = vpop.eup %2014  ;;  %v379_v36 = vsub.f32 %v363_v29, %v371_v31 }
 0x191   :  { %v406_v37 = vmul.f32 %v2013_v16, %v405_v34  ;;  %v412_v39 = vmul.f32 %v2015_v23, %v394_v17  ;;  %v308_v40 = vpop.xlane.xlu1 %307  ;;  %vm418_vm7 = vweird.f32 %v2015_v23 }
 0x192   :  { %v395_v44 = vadd.f32 1e-05, %v379_v36  ;;  %v2440_v45 = vmul.f32 0.03125, %v308_v40  ;;  %vm419_vm10 = vmor %vm417_vm8, %vm418_vm7 }
 0x193   :  { %v410_v27 = vsel %vm409_vm6, %v2013_v16, %v406_v37  ;;  %v413_v46 = vmul.f32 %v2015_v23, %v412_v39  ;;  %v348_v47 = vpop.xlane.xlu2 %347 }
 0x194   :  { %v481_v49 = vmul.f32 %v410_v27, %v385_v43  ;;  %2016 = vrsqrt.f32 %v395_v44  ;;  %v372_v51 = vmul.f32 %v2440_v45, %v2440_v45  ;;  %v364_v53 = vmul.f32 0.03125, %v348_v47 }
 0x195   :  { %v414_v52 = vmul.f32 0.5, %v413_v46  ;;  %vm427_vm13 = vweird.f32 %v395_v44 }
 0x196   :  { %v490_v60 = vmul.f32 %v2437_v41, %v481_v49  ;;  %v380_v57 = vsub.f32 %v364_v53, %v372_v51 }
 0x197   :  { %v415_v54 = vsub.f32 1.5, %v414_v52 }
 0x198   :  { %v499_v56 = vadd.f32 %v2443_v48, %v490_v60  ;;  %v2451_v55 = vadd.f32 1e-05, %v380_v57 }
 0x199   :  { %v416_v58 = vmul.f32 %v2015_v23, %v415_v54  ;;  %v311_v59 = vpop.xlane.xlu0 %310 }
 0x19a   :  { %v2017_v61 = vpop.eup %2016  ;;  %v2453_v62 = vmul.f32 0.03125, %v311_v59  ;;  %v507_v63 = vmax.f32 %v499_v56, 0.0  ;;  %2018 = vrsqrt.f32 %v2451_v55  ;;  %vm437_vm0 = vweird.f32 %v2451_v55 }
 0x19b   :  { %v422_v0 = vmul.f32 %v2017_v61, %v395_v44  ;;  %v314_v32 = vpop.xlane.xlu2 %313  ;;  %v351_v1 = vpop.xlane.xlu1 %350  ;;  %v420_v7 = vsel %vm419_vm10, %v2015_v23, %v416_v58  ;;  %vm428_vm12 = vweird.f32 %v2017_v61  ;;  %v388_v56 = vsub.f32 %v2362_v19, %v2440_v45 }
 0x19c   :  { %v373_v4 = vmul.f32 %v2453_v62, %v2453_v62  ;;  %v365_v5 = vmul.f32 0.03125, %v351_v1  ;;  %1946 = vmatmul.msk.f32.vlgmr.msrb.gmra.mxu3 %vm296_vm3, %v507_v63  ;;  %v482_v9 = vmul.f32 %v420_v7, %v386_v2  ;;  %v2463_v13 = vmul.f32 0.03125, %v314_v32  ;;  %vm429_vm14 = vmor %vm427_vm13, %vm428_vm12 }
 0x19d   :  { %v423_v6 = vmul.f32 %v2017_v61, %v422_v0  ;;  %v389_v28 = vsub.f32 %v2373_v38, %v2453_v62 }
 0x19e   :  { %v381_v8 = vsub.f32 %v365_v5, %v373_v4  ;;  %v491_v3 = vmul.f32 %v2437_v41, %v482_v9  ;;  %v374_v22 = vmul.f32 %v2463_v13, %v2463_v13  ;;  %v390_v62 = vsub.f32 %v2370_v35, %v2463_v13 }
 0x19f   :  { %v424_v12 = vmul.f32 0.5, %v423_v6 }
 0x1a0   :  { %v2465_v14 = vadd.f32 1e-05, %v381_v8  ;;  %v2019_v11 = vpop.eup %2018  ;;  %v500_v29 = vadd.f32 %v2443_v48, %v491_v3 }
 0x1a1   :  { %v425_v15 = vsub.f32 1.5, %v424_v12  ;;  %v354_v16 = vpop.xlane.xlu0 %353  ;;  %v432_v17 = vmul.f32 %v2019_v11, %v2451_v55  ;;  %vm438_vm15 = vweird.f32 %v2019_v11 }
 0x1a2   :  { %2020 = vrsqrt.f32 %v2465_v14  ;;  %v366_v21 = vmul.f32 0.03125, %v354_v16  ;;  %v508_v36 = vmax.f32 %v500_v29, 0.0  ;;  %vm439_vm1 = vmor %vm437_vm0, %vm438_vm15  ;;  %vm447_vm4 = vweird.f32 %v2465_v14 }
 0x1a3   :  { %v426_v18 = vmul.f32 %v2017_v61, %v425_v15  ;;  %v357_v20 = vpop.xlane.xlu2 %356  ;;  %v317_v25 = vpop.xlane.xlu1 %316  ;;  %v433_v31 = vmul.f32 %v2019_v11, %v432_v17 }
 0x1a4   :  { %v2475_v34 = vmul.f32 0.03125, %v317_v25  ;;  %v382_v23 = vsub.f32 %v366_v21, %v374_v22  ;;  %v367_v40 = vmul.f32 0.03125, %v357_v20  ;;  %1947 = vmatmul.msk.f32.gmra.mxu3 %vm296_vm3, %v508_v36 }
 0x1a5   :  { %v430_v37 = vsel %vm429_vm14, %v2017_v61, %v426_v18  ;;  %v434_v39 = vmul.f32 0.5, %v433_v31 }
 0x1a6   :  { %v375_v43 = vmul.f32 %v2475_v34, %v2475_v34  ;;  %v483_v44 = vmul.f32 %v430_v37, %v387_v30  ;;  %v398_v27 = vadd.f32 1e-05, %v382_v23  ;;  %v391_v35 = vsub.f32 %v2382_v42, %v2475_v34 }
 0x1a7   :  { %v435_v26 = vsub.f32 1.5, %v434_v39 }
 0x1a8   :  { %v2021_v10 = vpop.eup %2020  ;;  %v383_v46 = vsub.f32 %v367_v40, %v375_v43  ;;  %v492_v47 = vmul.f32 %v2437_v41, %v483_v44  ;;  %2022 = vrsqrt.f32 %v398_v27  ;;  %vm457_vm7 = vweird.f32 %v398_v27 }
 0x1a9   :  { %v442_v49 = vmul.f32 %v2021_v10, %v2465_v14  ;;  %v320_v51 = vpop.xlane.xlu0 %319  ;;  %v436_v24 = vmul.f32 %v2019_v11, %v435_v26  ;;  %vm448_vm2 = vweird.f32 %v2021_v10 }
 0x1aa   :  { %v399_v52 = vadd.f32 1e-05, %v383_v46  ;;  %v2484_v53 = vmul.f32 0.03125, %v320_v51  ;;  %v501_v60 = vadd.f32 %v2443_v48, %v492_v47  ;;  %vm449_vm5 = vmor %vm447_vm4, %vm448_vm2 }
 0x1ab   :  { %v443_v54 = vmul.f32 %v2021_v10, %v442_v49  ;;  %v360_v57 = vpop.xlane.xlu1 %359  ;;  %v440_v0 = vsel %vm439_vm1, %v2019_v11, %v436_v24  ;;  %vm638_vm1 = vcmask 130048  }
 0x1ac   :  { %2024 = vrsqrt.f32 %v399_v52  ;;  %v376_v58 = vmul.f32 %v2484_v53, %v2484_v53  ;;  %v368_v61 = vmul.f32 0.03125, %v360_v57  ;;  %v509_v63 = vmax.f32 %v501_v60, 0.0 }
 0x1ad   :  { %v444_v59 = vmul.f32 0.5, %v443_v54  ;;  %v484_v32 = vmul.f32 %v440_v0, %v388_v56  ;;  %vm467_vm12 = vweird.f32 %v399_v52  ;;  %v392_v46 = vsub.f32 %v2391_v50, %v2484_v53  ;;  %v2524_v50 = vld [vmem:[%s3402_s9] sm:$0x7] }
 0x1ae   :  { %v2023_v1 = vpop.eup %2022  ;;  %v384_v2 = vsub.f32 %v368_v61, %v376_v58  ;;  %1948 = vmatmul.msk.f32.gmra.mxu3 %vm296_vm3, %v509_v63  ;;  %v2527_v53 = vperm.slane %v2524_v50, 0 }
 0x1af   :  { %v445_v55 = vsub.f32 1.5, %v444_v59  ;;  %v452_v19 = vmul.f32 %v2023_v1, %v398_v27  ;;  %v493_v45 = vmul.f32 %v2437_v41, %v484_v32  ;;  %vm458_vm6 = vweird.f32 %v2023_v1 }
 0x1b0   :  { %v400_v5 = vadd.f32 1e-05, %v384_v2  ;;  %vm459_vm8 = vmor %vm457_vm7, %vm458_vm6 }
 0x1b1   :  { %v446_v4 = vmul.f32 %v2021_v10, %v445_v55  ;;  %v453_v7 = vmul.f32 %v2023_v1, %v452_v19  ;;  %v502_v8 = vadd.f32 %v2443_v48, %v493_v45 }
 0x1b2   :  { %v2025_v6 = vpop.eup %2024  ;;  %2026 = vrsqrt.f32 %v400_v5  ;;  %vm477_vm15 = vweird.f32 %v400_v5 }
 0x1b3   :  { %v462_v9 = vmul.f32 %v2025_v6, %v399_v52  ;;  %v454_v12 = vmul.f32 0.5, %v453_v7  ;;  %v450_v3 = vsel %vm449_vm5, %v2021_v10, %v446_v4  ;;  %v510_v15 = vmax.f32 %v502_v8, 0.0  ;;  %v540_v52 = vpop.f32.mrf.mxu2 }
 0x1b4   :  { %v485_v16 = vmul.f32 %v450_v3, %v389_v28  ;;  %vm468_vm10 = vweird.f32 %v2025_v6 }
 0x1b5   :  { %v463_v11 = vmul.f32 %v2025_v6, %v462_v9  ;;  %v455_v17 = vsub.f32 1.5, %v454_v12  ;;  %vm469_vm13 = vmor %vm467_vm12, %vm468_vm10 }
 0x1b6   :  { %1949 = vmatmul.msk.f32.gmra.mxu3 %vm296_vm3, %v510_v15  ;;  %v494_v18 = vmul.f32 %v2437_v41, %v485_v16 }
 0x1b7   :  { %v464_v14 = vmul.f32 0.5, %v463_v11  ;;  %v456_v22 = vmul.f32 %v2023_v1, %v455_v17 }
 0x1b8   :  { %v2027_v38 = vpop.eup %2026  ;;  %v503_v20 = vadd.f32 %v2443_v48, %v494_v18 }
 0x1b9   :  { %v465_v21 = vsub.f32 1.5, %v464_v14  ;;  %v472_v25 = vmul.f32 %v2027_v38, %v400_v5  ;;  %v460_v33 = vsel %vm459_vm8, %v2023_v1, %v456_v22  ;;  %vm478_vm14 = vweird.f32 %v2027_v38 }
 0x1ba   :  { %v486_v30 = vmul.f32 %v460_v33, %v390_v62  ;;  %v511_v23 = vmax.f32 %v503_v20, 0.0  ;;  %vm479_vm0 = vmor %vm477_vm15, %vm478_vm14 }
 0x1bb   :  { %v466_v29 = vmul.f32 %v2025_v6, %v465_v21  ;;  %v473_v31 = vmul.f32 %v2027_v38, %v472_v25  ;;  %v543_v60 = vpop.f32.mrf.mxu2 }
 0x1bc   :  { %v495_v36 = vmul.f32 %v2437_v41, %v486_v30 }
 0x1bd   :  { %v470_v37 = vsel %vm469_vm13, %v2025_v6, %v466_v29  ;;  %v474_v39 = vmul.f32 0.5, %v473_v31 }
 0x1be   :  { %1950 = vmatmul.msk.f32.gmra.mxu3 %vm296_vm3, %v511_v23  ;;  %v487_v40 = vmul.f32 %v470_v37, %v391_v35  ;;  %v504_v43 = vadd.f32 %v2443_v48, %v495_v36 }
 0x1bf   :  { %v475_v13 = vsub.f32 1.5, %v474_v39 }
 0x1c0   :  { %v512_v27 = vmax.f32 %v504_v43, 0.0  ;;  %v496_v10 = vmul.f32 %v2437_v41, %v487_v40 }
 0x1c1   :  { %v476_v44 = vmul.f32 %v2027_v38, %v475_v13 }
 0x1c2   :  { %v505_v42 = vadd.f32 %v2443_v48, %v496_v10 }
 0x1c3   :  { %v480_v26 = vsel %vm479_vm0, %v2027_v38, %v476_v44  ;;  %v546_v59 = vpop.f32.mrf.mxu2 }
 0x1c4   :  { %v488_v34 = vmul.f32 %v480_v26, %v392_v46  ;;  %v513_v47 = vmax.f32 %v505_v42, 0.0  ;;  %v1138_v42 = vld [vmem:[%s3403_s12 + $0x8] sm:$0xff] }
 0x1c5   :  { %1153 = vmatpush.msrb.mxu0 %v1138_v42 }
 0x1c6   :  { %1951 = vmatmul.msk.f32.gmra.mxu3 %vm296_vm3, %v512_v27  ;;  %v497_v49 = vmul.f32 %v2437_v41, %v488_v34 }
 0x1c8   :  { %v506_v51 = vadd.f32 %v2443_v48, %v497_v49 }
 0x1ca   :  { %v514_v24 = vmax.f32 %v506_v51, 0.0  ;;  %v859_v51 = vld [vmem:[%s3404_s10 + $0x8] sm:$0xff] }
 0x1cb   :  { %v549_v55 = vpop.f32.mrf.mxu2  ;;  %899 = vmatpush.msrb.mxu1 %v859_v51 }
 0x1ce   :  { %1952 = vmatmul.msk.f32.gmra.mxu3 %vm296_vm3, %v513_v47 }
 0x1d3   :  { %v552_v28 = vpop.f32.mrf.mxu2 }
 0x1d6   :  { %1953 = vmatmul.msk.f32.gmra.mxu3 %vm296_vm3, %v514_v24 }
 0x1db   :  { %v555_v14 = vpop.f32.mrf.mxu2 }
 0x1e3   :  { %v558_v33 = vpop.f32.mrf.mxu2 }
 0x1eb   :  { %v561_v13 = vpop.f32.mrf.mxu2 }
 0x21f   :  { %v605_v54 = vpop.f32.mrf.mxu3 }
 0x220   :  { %v606_v57 = vadd.f32 %v605_v54, %v540_v52 }
 0x222   :  { %v2530_v41 = vadd.f32 %v2527_v53, %v606_v57 }
 0x224   :  { %v639_v48 = vsel %vm638_vm1, %v2530_v41, 0.0  ;;  %v671_v56 = vmul.f32 %v2530_v41, %v2530_v41 }
 0x225   :  { %640 = vadd.xlane.f32.xlu2 %v639_v48 }
 0x226   :  { %v679_v58 = vsel %vm638_vm1, %v671_v56, 0.0 }
 0x227   :  { %680 = vadd.xlane.f32.xlu0 %v679_v58  ;;  %v608_v61 = vpop.f32.mrf.mxu3 }
 0x228   :  { %v609_v63 = vadd.f32 %v608_v61, %v543_v60  ;;  %v858_v60 = vld [vmem:[%s3404_s10] sm:$0xff] }
 0x229   :  { %900 = vmatpush.msrb.mxu1 %v858_v60 }
 0x22a   :  { %v2538_v0 = vadd.f32 %v2527_v53, %v609_v63 }
 0x22c   :  { %v642_v32 = vsel %vm638_vm1, %v2538_v0, 0.0  ;;  %v672_v1 = vmul.f32 %v2538_v0, %v2538_v0 }
 0x22d   :  { %643 = vadd.xlane.f32.xlu1 %v642_v32 }
 0x22e   :  { %v682_v2 = vsel %vm638_vm1, %v672_v1, 0.0 }
 0x22f   :  { %683 = vadd.xlane.f32.xlu2 %v682_v2 }
 0x231   :  { %v611_v19 = vpop.f32.mrf.mxu3 }
 0x232   :  { %v612_v45 = vadd.f32 %v611_v19, %v546_v59 }
 0x234   :  { %v2546_v4 = vadd.f32 %v2527_v53, %v612_v45 }
 0x236   :  { %v645_v5 = vsel %vm638_vm1, %v2546_v4, 0.0  ;;  %v673_v6 = vmul.f32 %v2546_v4, %v2546_v4 }
 0x237   :  { %646 = vadd.xlane.f32.xlu0 %v645_v5 }
 0x238   :  { %v685_v7 = vsel %vm638_vm1, %v673_v6, 0.0 }
 0x239   :  { %686 = vadd.xlane.f32.xlu1 %v685_v7  ;;  %v614_v8 = vpop.f32.mrf.mxu3 }
 0x23a   :  { %v615_v9 = vadd.f32 %v614_v8, %v549_v55 }
 0x23c   :  { %v2554_v12 = vadd.f32 %v2527_v53, %v615_v9 }
 0x23e   :  { %v648_v3 = vsel %vm638_vm1, %v2554_v12, 0.0  ;;  %v674_v11 = vmul.f32 %v2554_v12, %v2554_v12 }
 0x23f   :  { %649 = vadd.xlane.f32.xlu2 %v648_v3 }
 0x240   :  { %v688_v15 = vsel %vm638_vm1, %v674_v11, 0.0  ;;  %v2610_v11 = vperm.slane %v2524_v50, 1 }
 0x241   :  { %689 = vadd.xlane.f32.xlu0 %v688_v15  ;;  %v617_v16 = vpop.f32.mrf.mxu3 }
 0x242   :  { %v618_v17 = vadd.f32 %v617_v16, %v552_v28 }
 0x244   :  { %v2562_v18 = vadd.f32 %v2527_v53, %v618_v17 }
 0x246   :  { %v651_v22 = vsel %vm638_vm1, %v2562_v18, 0.0  ;;  %v675_v38 = vmul.f32 %v2562_v18, %v2562_v18 }
 0x247   :  { %652 = vadd.xlane.f32.xlu1 %v651_v22  ;;  %v2614_v22 = vperm.slane %v2524_v50, 2 }
 0x248   :  { %v691_v62 = vsel %vm638_vm1, %v675_v38, 0.0 }
 0x249   :  { %v620_v21 = vpop.f32.mrf.mxu3  ;;  %692 = vadd.xlane.f32.xlu2 %v691_v62 }
 0x24a   :  { %v621_v20 = vadd.f32 %v620_v21, %v555_v14 }
 0x24c   :  { %v2570_v25 = vadd.f32 %v2527_v53, %v621_v20 }
 0x24e   :  { %v654_v29 = vsel %vm638_vm1, %v2570_v25, 0.0  ;;  %v676_v30 = vmul.f32 %v2570_v25, %v2570_v25 }
 0x24f   :  { %655 = vadd.xlane.f32.xlu0 %v654_v29 }
 0x250   :  { %v694_v31 = vsel %vm638_vm1, %v676_v30, 0.0 }
 0x251   :  { %695 = vadd.xlane.f32.xlu1 %v694_v31  ;;  %v623_v23 = vpop.f32.mrf.mxu3 }
 0x252   :  { %v624_v36 = vadd.f32 %v623_v23, %v558_v33 }
 0x254   :  { %v2578_v37 = vadd.f32 %v2527_v53, %v624_v36 }
 0x256   :  { %v657_v39 = vsel %vm638_vm1, %v2578_v37, 0.0  ;;  %v677_v35 = vmul.f32 %v2578_v37, %v2578_v37 }
 0x257   :  { %658 = vadd.xlane.f32.xlu2 %v657_v39 }
 0x258   :  { %v697_v40 = vsel %vm638_vm1, %v677_v35, 0.0 }
 0x259   :  { %698 = vadd.xlane.f32.xlu0 %v697_v40  ;;  %v626_v43 = vpop.f32.mrf.mxu3 }
 0x25a   :  { %v627_v44 = vadd.f32 %v626_v43, %v561_v13 }
 0x25c   :  { %v2586_v27 = vadd.f32 %v2527_v53, %v627_v44  ;;  %v1137_v53 = vld [vmem:[%s3403_s12] sm:$0xff] }
 0x25d   :  { %1154 = vmatpush.msrb.mxu0 %v1137_v53 }
 0x25e   :  { %v660_v10 = vsel %vm638_vm1, %v2586_v27, 0.0  ;;  %v678_v26 = vmul.f32 %v2586_v27, %v2586_v27 }
 0x25f   :  { %661 = vadd.xlane.f32.xlu1 %v660_v10 }
 0x260   :  { %v700_v46 = vsel %vm638_vm1, %v678_v26, 0.0 }
 0x261   :  { %701 = vadd.xlane.f32.xlu2 %v700_v46 }
 0x298   :  { %v641_v34 = vpop.xlane.xlu2 %640 }
 0x299   :  { %v663_v47 = vmul.f32 0.0625, %v641_v34 }
 0x29a   :  { %v681_v49 = vpop.xlane.xlu0 %680 }
 0x29b   :  { %v711_v24 = vmul.f32 %v663_v47, %v663_v47  ;;  %v703_v52 = vmul.f32 0.0625, %v681_v49  ;;  %v727_v15 = vsub.f32 %v2530_v41, %v663_v47 }
 0x29d   :  { %v719_v54 = vsub.f32 %v703_v52, %v711_v24 }
 0x29f   :  { %v735_v57 = vadd.f32 1e-05, %v719_v54 }
 0x2a0   :  { %v644_v48 = vpop.xlane.xlu1 %643 }
 0x2a1   :  { %2028 = vrsqrt.f32 %v735_v57  ;;  %v664_v56 = vmul.f32 0.0625, %v644_v48  ;;  %vm749_vm4 = vweird.f32 %v735_v57 }
 0x2a2   :  { %v684_v58 = vpop.xlane.xlu2 %683 }
 0x2a3   :  { %v712_v59 = vmul.f32 %v664_v56, %v664_v56  ;;  %v704_v61 = vmul.f32 0.0625, %v684_v58  ;;  %v728_v26 = vsub.f32 %v2538_v0, %v664_v56 }
 0x2a5   :  { %v720_v1 = vsub.f32 %v704_v61, %v712_v59 }
 0x2a7   :  { %v2029_v63 = vpop.eup %2028  ;;  %v736_v2 = vadd.f32 1e-05, %v720_v1 }
 0x2a8   :  { %v744_v32 = vmul.f32 %v2029_v63, %v735_v57  ;;  %vm750_vm2 = vweird.f32 %v2029_v63 }
 0x2a9   :  { %2030 = vrsqrt.f32 %v736_v2  ;;  %vm751_vm5 = vmor %vm749_vm4, %vm750_vm2  ;;  %vm759_vm7 = vweird.f32 %v736_v2 }
 0x2aa   :  { %v745_v55 = vmul.f32 %v2029_v63, %v744_v32  ;;  %v647_v19 = vpop.xlane.xlu0 %646 }
 0x2ab   :  { %v2605_v5 = vmul.f32 0.0625, %v647_v19 }
 0x2ac   :  { %v746_v45 = vmul.f32 0.5, %v745_v55  ;;  %v687_v6 = vpop.xlane.xlu1 %686 }
 0x2ad   :  { %v713_v8 = vmul.f32 %v2605_v5, %v2605_v5  ;;  %v705_v28 = vmul.f32 0.0625, %v687_v6  ;;  %v729_v61 = vsub.f32 %v2546_v4, %v2605_v5 }
 0x2ae   :  { %v747_v7 = vsub.f32 1.5, %v746_v45 }
 0x2af   :  { %v721_v3 = vsub.f32 %v705_v28, %v713_v8  ;;  %v2031_v16 = vpop.eup %2030 }
 0x2b0   :  { %v748_v9 = vmul.f32 %v2029_v63, %v747_v7  ;;  %v754_v62 = vmul.f32 %v2031_v16, %v736_v2  ;;  %vm760_vm6 = vweird.f32 %v2031_v16 }
 0x2b1   :  { %v737_v14 = vadd.f32 1e-05, %v721_v3  ;;  %vm761_vm8 = vmor %vm759_vm7, %vm760_vm6 }
 0x2b2   :  { %v752_v17 = vsel %vm751_vm5, %v2029_v63, %v748_v9  ;;  %v650_v21 = vpop.xlane.xlu2 %649  ;;  %v755_v33 = vmul.f32 %v2031_v16, %v754_v62 }
 0x2b3   :  { %v823_v38 = vmul.f32 %v752_v17, %v727_v15  ;;  %2032 = vrsqrt.f32 %v737_v14  ;;  %v2616_v20 = vmul.f32 0.0625, %v650_v21  ;;  %vm769_vm12 = vweird.f32 %v737_v14 }
 0x2b4   :  { %v690_v29 = vpop.xlane.xlu0 %689  ;;  %v756_v23 = vmul.f32 0.5, %v755_v33 }
 0x2b5   :  { %v832_v30 = vmul.f32 %v2610_v11, %v823_v38  ;;  %v714_v41 = vmul.f32 %v2616_v20, %v2616_v20  ;;  %v706_v31 = vmul.f32 0.0625, %v690_v29 }
 0x2b6   :  { %v757_v50 = vsub.f32 1.5, %v756_v23 }
 0x2b7   :  { %v841_v36 = vadd.f32 %v2614_v22, %v832_v30  ;;  %v722_v39 = vsub.f32 %v706_v31, %v714_v41 }
 0x2b8   :  { %v758_v43 = vmul.f32 %v2031_v16, %v757_v50 }
 0x2b9   :  { %v849_v35 = vmax.f32 %v841_v36, 0.0  ;;  %v2033_v13 = vpop.eup %2032  ;;  %v738_v40 = vadd.f32 1e-05, %v722_v39 }
 0x2ba   :  { %v764_v44 = vmul.f32 %v2033_v13, %v737_v14  ;;  %v653_v10 = vpop.xlane.xlu1 %652  ;;  %v762_v47 = vsel %vm761_vm8, %v2031_v16, %v758_v43  ;;  %vm770_vm10 = vweird.f32 %v2033_v13  ;;  %v730_v14 = vsub.f32 %v2554_v12, %v2616_v20 }
 0x2bb   :  { %1954 = vmatmul.msk.f32.vlgmr.msrb.gmra.mxu1 %vm638_vm1, %v849_v35  ;;  %1962 = vmatmul.msk.f32.vlgmr.msrb.gmra.mxu0 %vm638_vm1, %v849_v35  ;;  %2034 = vrsqrt.f32 %v738_v40  ;;  %v2625_v46 = vmul.f32 0.0625, %v653_v10  ;;  %v824_v24 = vmul.f32 %v762_v47, %v728_v26  ;;  %vm771_vm13 = vmor %vm769_vm12, %vm770_vm10  ;;  %vm779_vm15 = vweird.f32 %v738_v40 }
 0x2bc   :  { %v765_v42 = vmul.f32 %v2033_v13, %v764_v44  ;;  %v693_v34 = vpop.xlane.xlu2 %692 }
 0x2bd   :  { %v715_v49 = vmul.f32 %v2625_v46, %v2625_v46  ;;  %v707_v51 = vmul.f32 0.0625, %v693_v34  ;;  %v833_v60 = vmul.f32 %v2610_v11, %v824_v24  ;;  %v731_v44 = vsub.f32 %v2562_v18, %v2625_v46  ;;  %v1185_v18 = vld [vmem:[%s3405_s14 + $0x10] sm:$0xff]  ;;  %v1182_v46 = vld [vmem:[%s3406_s13 + $0x8] sm:$0xff] }
 0x2be   :  { %v766_v52 = vmul.f32 0.5, %v765_v42  ;;  %1199 = vmatpush.msra.mxu2 %v1185_v18  ;;  %1265 = vmatpush.msra.mxu3 %v1182_v46 }
 0x2bf   :  { %v723_v53 = vsub.f32 %v707_v51, %v715_v49  ;;  %v842_v48 = vadd.f32 %v2614_v22, %v833_v60  ;;  %v1181_v60 = vld [vmem:[%s3406_s13] sm:$0xff] }
 0x2c0   :  { %v767_v54 = vsub.f32 1.5, %v766_v52  ;;  %v1184_v52 = vld [vmem:[%s3405_s14 + $0x8] sm:$0xff]  ;;  %1266 = vmatpush.msra.mxu3 %v1181_v60 }
 0x2c1   :  { %v2035_v57 = vpop.eup %2034  ;;  %v739_v0 = vadd.f32 1e-05, %v723_v53  ;;  %v850_v32 = vmax.f32 %v842_v48, 0.0  ;;  %1200 = vmatpush.msra.mxu2 %v1184_v52 }
 0x2c2   :  { %v768_v56 = vmul.f32 %v2033_v13, %v767_v54  ;;  %v774_v58 = vmul.f32 %v2035_v57, %v738_v40  ;;  %v656_v59 = vpop.xlane.xlu0 %655  ;;  %vm780_vm14 = vweird.f32 %v2035_v57 }
 0x2c3   :  { %2036 = vrsqrt.f32 %v739_v0  ;;  %v2633_v63 = vmul.f32 0.0625, %v656_v59  ;;  %1955 = vmatmul.msk.f32.gmra.mxu1 %vm638_vm1, %v850_v32  ;;  %1963 = vmatmul.msk.f32.gmra.mxu0 %vm638_vm1, %v850_v32  ;;  %vm781_vm0 = vmor %vm779_vm15, %vm780_vm14  ;;  %vm789_vm4 = vweird.f32 %v739_v0 }
 0x2c4   :  { %v775_v1 = vmul.f32 %v2035_v57, %v774_v58  ;;  %v696_v55 = vpop.xlane.xlu1 %695  ;;  %v772_v2 = vsel %vm771_vm13, %v2033_v13, %v768_v56 }
 0x2c5   :  { %v716_v19 = vmul.f32 %v2633_v63, %v2633_v63  ;;  %v708_v45 = vmul.f32 0.0625, %v696_v55  ;;  %v825_v6 = vmul.f32 %v772_v2, %v729_v61  ;;  %v2690_v2 = vld [vmem:[%s3397_s0] sm:$0xff] }
 0x2c6   :  { %v776_v7 = vmul.f32 0.5, %v775_v1  ;;  %v732_v1 = vsub.f32 %v2570_v25, %v2633_v63 }
 0x2c7   :  { %v724_v8 = vsub.f32 %v708_v45, %v716_v19  ;;  %v834_v4 = vmul.f32 %v2610_v11, %v825_v6 }
 0x2c8   :  { %v777_v5 = vsub.f32 1.5, %v776_v7 }
 0x2c9   :  { %v2037_v28 = vpop.eup %2036  ;;  %v2640_v9 = vadd.f32 1e-05, %v724_v8  ;;  %v843_v3 = vadd.f32 %v2614_v22, %v834_v4 }
 0x2ca   :  { %v778_v15 = vmul.f32 %v2035_v57, %v777_v5  ;;  %v784_v16 = vmul.f32 %v2037_v28, %v739_v0  ;;  %v659_v17 = vpop.xlane.xlu2 %658  ;;  %vm790_vm2 = vweird.f32 %v2037_v28  ;;  %v1183_v0 = vld [vmem:[%s3405_s14] sm:$0xff] }
 0x2cb   :  { %2038 = vrsqrt.f32 %v2640_v9  ;;  %v2646_v38 = vmul.f32 0.0625, %v659_v17  ;;  %v851_v62 = vmax.f32 %v843_v3, 0.0  ;;  %vm791_vm5 = vmor %vm789_vm4, %vm790_vm2  ;;  %vm799_vm7 = vweird.f32 %v2640_v9  ;;  %1201 = vmatpush.msra.mxu2 %v1183_v0 }
 0x2cc   :  { %v785_v21 = vmul.f32 %v2037_v28, %v784_v16  ;;  %v699_v33 = vpop.xlane.xlu0 %698  ;;  %v782_v29 = vsel %vm781_vm0, %v2035_v57, %v778_v15  ;;  %1970 = vmatmul.msk.f32.vlgmr.msra.gmra.mxu2 %vm151_vm9, %v2690_v2  ;;  %v2704_v15 = vld [vmem:[%s3397_s0 + $0x8] sm:$0xff] }
 0x2cd   :  { %v717_v30 = vmul.f32 %v2646_v38, %v2646_v38  ;;  %v709_v41 = vmul.f32 0.0625, %v699_v33  ;;  %1956 = vmatmul.msk.f32.gmra.mxu1 %vm638_vm1, %v851_v62  ;;  %1964 = vmatmul.msk.f32.gmra.mxu0 %vm638_vm1, %v851_v62  ;;  %v826_v31 = vmul.f32 %v782_v29, %v730_v14 }
 0x2ce   :  { %v786_v23 = vmul.f32 0.5, %v785_v21 }
 0x2cf   :  { %v725_v12 = vsub.f32 %v709_v41, %v717_v30  ;;  %v835_v20 = vmul.f32 %v2610_v11, %v826_v31  ;;  %v2717_v41 = vld [vmem:[%s3397_s0 + $0x10] sm:$0xff] }
 0x2d0   :  { %v787_v36 = vsub.f32 1.5, %v786_v23 }
 0x2d1   :  { %v2039_v39 = vpop.eup %2038  ;;  %v2653_v50 = vadd.f32 1e-05, %v725_v12  ;;  %v844_v35 = vadd.f32 %v2614_v22, %v835_v20 }
 0x2d2   :  { %v788_v13 = vmul.f32 %v2037_v28, %v787_v36  ;;  %v794_v40 = vmul.f32 %v2039_v39, %v2640_v9  ;;  %v662_v43 = vpop.xlane.xlu1 %661  ;;  %vm800_vm6 = vweird.f32 %v2039_v39  ;;  %v733_v9 = vsub.f32 %v2578_v37, %v2646_v38  ;;  %v2728_v36 = vld [vmem:[%s3397_s0 + $0x18] sm:$0xff] }
 0x2d3   :  { %2040 = vrsqrt.f32 %v2653_v50  ;;  %v2660_v10 = vmul.f32 0.0625, %v662_v43  ;;  %v852_v26 = vmax.f32 %v844_v35, 0.0  ;;  %vm801_vm8 = vmor %vm799_vm7, %vm800_vm6  ;;  %vm809_vm12 = vweird.f32 %v2653_v50 }
 0x2d4   :  { %v795_v42 = vmul.f32 %v2039_v39, %v794_v40  ;;  %v702_v34 = vpop.xlane.xlu2 %701  ;;  %v792_v47 = vsel %vm791_vm5, %v2037_v28, %v788_v13  ;;  %1971 = vmatmul.msk.f32.gmra.mxu2 %vm151_vm9, %v2704_v15 }
 0x2d5   :  { %v718_v49 = vmul.f32 %v2660_v10, %v2660_v10  ;;  %v710_v51 = vmul.f32 0.0625, %v702_v34  ;;  %1957 = vmatmul.msk.f32.gmra.mxu1 %vm638_vm1, %v852_v26  ;;  %1965 = vmatmul.msk.f32.gmra.mxu0 %vm638_vm1, %v852_v26  ;;  %v827_v24 = vmul.f32 %v792_v47, %v731_v44  ;;  %v734_v29 = vsub.f32 %v2586_v27, %v2660_v10  ;;  %v2773_v47 = vld [vmem:[%s3407_s15] sm:$0x7] }
 0x2d6   :  { %v796_v53 = vmul.f32 0.5, %v795_v42 }
 0x2d7   :  { %v726_v54 = vsub.f32 %v710_v51, %v718_v49  ;;  %v836_v57 = vmul.f32 %v2610_v11, %v827_v24  ;;  %v2776_v49 = vperm.slane %v2773_v47, 0 }
 0x2d8   :  { %v797_v48 = vsub.f32 1.5, %v796_v53 }
 0x2d9   :  { %v2041_v56 = vpop.eup %2040  ;;  %v742_v58 = vadd.f32 1e-05, %v726_v54  ;;  %v845_v59 = vadd.f32 %v2614_v22, %v836_v57 }
 0x2da   :  { %v798_v61 = vmul.f32 %v2039_v39, %v797_v48  ;;  %v804_v32 = vmul.f32 %v2041_v56, %v2653_v50  ;;  %vm810_vm10 = vweird.f32 %v2041_v56  ;;  %v2758_v50 = vld [vmem:[%s3397_s0 + $0x38] sm:$0xff] }
 0x2db   :  { %2042 = vrsqrt.f32 %v742_v58  ;;  %v853_v55 = vmax.f32 %v845_v59, 0.0  ;;  %vm811_vm13 = vmor %vm809_vm12, %vm810_vm10  ;;  %vm819_vm15 = vweird.f32 %v742_v58 }
 0x2dc   :  { %v805_v19 = vmul.f32 %v2041_v56, %v804_v32  ;;  %v802_v45 = vsel %vm801_vm8, %v2039_v39, %v798_v61  ;;  %1972 = vmatmul.msk.f32.gmra.mxu2 %vm151_vm9, %v2717_v41  ;;  %v2737_v39 = vld [vmem:[%s3397_s0 + $0x20] sm:$0xff] }
 0x2dd   :  { %1958 = vmatmul.msk.f32.gmra.mxu1 %vm638_vm1, %v853_v55  ;;  %1966 = vmatmul.msk.f32.gmra.mxu0 %vm638_vm1, %v853_v55  ;;  %v828_v6 = vmul.f32 %v802_v45, %v732_v1 }
 0x2de   :  { %v806_v7 = vmul.f32 0.5, %v805_v19 }
 0x2df   :  { %v837_v25 = vmul.f32 %v2610_v11, %v828_v6 }
 0x2e0   :  { %v807_v63 = vsub.f32 1.5, %v806_v7 }
 0x2e1   :  { %v2043_v8 = vpop.eup %2042  ;;  %v846_v4 = vadd.f32 %v2614_v22, %v837_v25 }
 0x2e2   :  { %v808_v5 = vmul.f32 %v2041_v56, %v807_v63  ;;  %v814_v28 = vmul.f32 %v2043_v8, %v742_v58  ;;  %vm820_vm14 = vweird.f32 %v2043_v8 }
 0x2e3   :  { %v854_v3 = vmax.f32 %v846_v4, 0.0  ;;  %vm821_vm0 = vmor %vm819_vm15, %vm820_vm14 }
 0x2e4   :  { %v815_v16 = vmul.f32 %v2043_v8, %v814_v28  ;;  %v812_v17 = vsel %vm811_vm13, %v2041_v56, %v808_v5  ;;  %1973 = vmatmul.msk.f32.gmra.mxu2 %vm151_vm9, %v2728_v36 }
 0x2e5   :  { %1959 = vmatmul.msk.f32.gmra.mxu1 %vm638_vm1, %v854_v3  ;;  %1967 = vmatmul.msk.f32.gmra.mxu0 %vm638_vm1, %v854_v3  ;;  %v829_v14 = vmul.f32 %v812_v17, %v733_v9 }
 0x2e6   :  { %v816_v62 = vmul.f32 0.5, %v815_v16 }
 0x2e7   :  { %v838_v37 = vmul.f32 %v2610_v11, %v829_v14 }
 0x2e8   :  { %v817_v38 = vsub.f32 1.5, %v816_v62 }
 0x2e9   :  { %v847_v21 = vadd.f32 %v2614_v22, %v838_v37 }
 0x2ea   :  { %v818_v33 = vmul.f32 %v2043_v8, %v817_v38 }
 0x2eb   :  { %v855_v30 = vmax.f32 %v847_v21, 0.0 }
 0x2ec   :  { %v822_v31 = vsel %vm821_vm0, %v2043_v8, %v818_v33  ;;  %1974 = vmatmul.msk.f32.gmra.mxu2 %vm151_vm9, %v2737_v39 }
 0x2ed   :  { %1960 = vmatmul.msk.f32.gmra.mxu1 %vm638_vm1, %v855_v30  ;;  %1968 = vmatmul.msk.f32.gmra.mxu0 %vm638_vm1, %v855_v30  ;;  %v830_v23 = vmul.f32 %v822_v31, %v734_v29 }
 0x2ef   :  { %v839_v12 = vmul.f32 %v2610_v11, %v830_v23  ;;  %v2744_v11 = vld [vmem:[%s3397_s0 + $0x28] sm:$0xff] }
 0x2f1   :  { %v848_v27 = vadd.f32 %v2614_v22, %v839_v12  ;;  %v2751_v22 = vld [vmem:[%s3397_s0 + $0x30] sm:$0xff] }
 0x2f3   :  { %v856_v20 = vmax.f32 %v848_v27, 0.0 }
 0x2f4   :  { %1975 = vmatmul.msk.f32.gmra.mxu2 %vm151_vm9, %v2744_v11 }
 0x2f5   :  { %1961 = vmatmul.msk.f32.gmra.mxu1 %vm638_vm1, %v856_v20  ;;  %1969 = vmatmul.msk.f32.gmra.mxu0 %vm638_vm1, %v856_v20 }
 0x2fc   :  { %1976 = vmatmul.msk.f32.gmra.mxu2 %vm151_vm9, %v2751_v22 }
 0x304   :  { %1977 = vmatmul.msk.f32.gmra.mxu2 %vm151_vm9, %v2758_v50 }
 0x338   :  { %v1156_v35 = vpop.f32.mrf.mxu0  ;;  %v2786_v48 = vpop.f32.mrf.mxu1 }
 0x339   :  { %1978 = vmatmul.msk.f32.vlgmr.msra.gmra.mxu3 %vm638_vm1, %v1156_v35 }
 0x340   :  { %v1159_v13 = vpop.f32.mrf.mxu0  ;;  %v2799_v45 = vpop.f32.mrf.mxu1 }
 0x341   :  { %1979 = vmatmul.msk.f32.gmra.mxu3 %vm638_vm1, %v1159_v13 }
 0x34a   :  { %v1162_v40 = vpop.f32.mrf.mxu0  ;;  %v908_v28 = vpop.f32.mrf.mxu1 }
 0x34b   :  { %1980 = vmatmul.msk.f32.gmra.mxu3 %vm638_vm1, %v1162_v40 }
 0x34f   :  { %v1203_v34 = vpop.f32.mrf.mxu2 }
 0x352   :  { %v1165_v43 = vpop.f32.mrf.mxu0  ;;  %v911_v33 = vpop.f32.mrf.mxu1 }
 0x353   :  { %1981 = vmatmul.msk.f32.gmra.mxu3 %vm638_vm1, %v1165_v43 }
 0x357   :  { %v1206_v51 = vpop.f32.mrf.mxu2 }
 0x35a   :  { %v1168_v44 = vpop.f32.mrf.mxu0  ;;  %v914_v13 = vpop.f32.mrf.mxu1 }
 0x35b   :  { %1982 = vmatmul.msk.f32.gmra.mxu3 %vm638_vm1, %v1168_v44 }
 0x35f   :  { %v1209_v54 = vpop.f32.mrf.mxu2 }
 0x362   :  { %v1171_v10 = vpop.f32.mrf.mxu0 }
 0x363   :  { %1983 = vmatmul.msk.f32.gmra.mxu3 %vm638_vm1, %v1171_v10  ;;  %v2836_v10 = vld [vmem:[%s3408_s11] sm:$0x7] }
 0x367   :  { %v1212_v61 = vpop.f32.mrf.mxu2 }
 0x36a   :  { %v1174_v26 = vpop.f32.mrf.mxu0 }
 0x36b   :  { %1984 = vmatmul.msk.f32.gmra.mxu3 %vm638_vm1, %v1174_v26 }
 0x36f   :  { %v1215_v8 = vpop.f32.mrf.mxu2 }
 0x372   :  { %v1177_v42 = vpop.f32.mrf.mxu0 }
 0x373   :  { %1985 = vmatmul.msk.f32.gmra.mxu3 %vm638_vm1, %v1177_v42  ;;  %vm926_vm1 = vcmask 39936  }
 0x377   :  { %v1218_v62 = vpop.f32.mrf.mxu2 }
 0x37f   :  { %v1221_v12 = vpop.f32.mrf.mxu2 }
 0x3bc   :  { %v1268_v24 = vpop.f32.mrf.mxu3 }
 0x3bd   :  { %v1269_v18 = vadd.f32 %v1268_v24, %v1203_v34  ;;  %v1224_v34 = vpop.f32.mrf.mxu2 }
 0x3bf   :  { %v2779_v46 = vadd.f32 %v2776_v49, %v1269_v18 }
 0x3c1   :  { %v1301_v52 = vsel %vm296_vm3, %v2779_v46, 0.0  ;;  %v1333_v53 = vmul.f32 %v2779_v46, %v2779_v46 }
 0x3c2   :  { %1302 = vadd.xlane.f32.xlu0 %v1301_v52  ;;  %v1526_v52 = vld [vmem:[%s3409_s17 + $0x10] sm:$0xff] }
 0x3c3   :  { %v1341_v60 = vsel %vm296_vm3, %v1333_v53, 0.0  ;;  %v1523_v53 = vld [vmem:[%s3410_s16 + $0x18] sm:$0xff]  ;;  %1540 = vmatpush.msra.mxu1 %v1526_v52 }
 0x3c4   :  { %1342 = vadd.xlane.f32.xlu1 %v1341_v60  ;;  %v1271_v57 = vpop.f32.mrf.mxu3  ;;  %1604 = vmatpush.msra.mxu0 %v1523_v53 }
 0x3c5   :  { %v1272_v0 = vadd.f32 %v1271_v57, %v1206_v51  ;;  %v860_v51 = vperm.slane %v2836_v10, 0 }
 0x3c7   :  { %v2789_v56 = vadd.f32 %v2776_v49, %v1272_v0  ;;  %v2851_v57 = vadd.f32 %v2786_v48, %v860_v51  ;;  %v2864_v48 = vadd.f32 %v2799_v45, %v860_v51  ;;  %v1522_v45 = vld [vmem:[%s3410_s16 + $0x10] sm:$0xff] }
 0x3c8   :  { %1605 = vmatpush.msra.mxu0 %v1522_v45 }
 0x3c9   :  { %v1304_v58 = vsel %vm296_vm3, %v2789_v56, 0.0  ;;  %v1334_v59 = vmul.f32 %v2789_v56, %v2789_v56 }
 0x3ca   :  { %1305 = vadd.xlane.f32.xlu2 %v1304_v58 }
 0x3cb   :  { %v1344_v32 = vsel %vm296_vm3, %v1334_v59, 0.0 }
 0x3cc   :  { %1345 = vadd.xlane.f32.xlu0 %v1344_v32 }
 0x3ce   :  { %v1274_v1 = vpop.f32.mrf.mxu3 }
 0x3cf   :  { %v1275_v55 = vadd.f32 %v1274_v1, %v1209_v54  ;;  %v917_v54 = vpop.f32.mrf.mxu1  ;;  %v2868_v1 = vadd.f32 %v911_v33, %v860_v51 }
 0x3d1   :  { %v2797_v19 = vadd.f32 %v2776_v49, %v1275_v55 }
 0x3d3   :  { %v1307_v6 = vsel %vm296_vm3, %v2797_v19, 0.0  ;;  %v1335_v7 = vmul.f32 %v2797_v19, %v2797_v19 }
 0x3d4   :  { %1308 = vadd.xlane.f32.xlu1 %v1307_v6  ;;  %v930_v6 = vsel %vm926_vm1, %v2864_v48, 0.0 }
 0x3d5   :  { %v1347_v25 = vsel %vm296_vm3, %v1335_v7, 0.0  ;;  %v936_v7 = vsel %vm926_vm1, %v2868_v1, 0.0 }
 0x3d6   :  { %1348 = vadd.xlane.f32.xlu2 %v1347_v25  ;;  %v1277_v63 = vpop.f32.mrf.mxu3 }
 0x3d7   :  { %v1278_v4 = vadd.f32 %v1277_v63, %v1212_v61  ;;  %v927_v61 = vsel %vm926_vm1, %v2851_v57, 0.0  ;;  %v920_v55 = vpop.f32.mrf.mxu1  ;;  %v1525_v63 = vld [vmem:[%s3409_s17 + $0x8] sm:$0xff] }
 0x3d8   :  { %1541 = vmatpush.msra.mxu1 %v1525_v63 }
 0x3d9   :  { %v2807_v5 = vadd.f32 %v2776_v49, %v1278_v4  ;;  %v2884_v4 = vadd.f32 %v917_v54, %v860_v51  ;;  %v1524_v54 = vld [vmem:[%s3409_s17] sm:$0xff] }
 0x3da   :  { %1542 = vmatpush.msra.mxu1 %v1524_v54 }
 0x3db   :  { %v1310_v9 = vsel %vm296_vm3, %v2807_v5, 0.0  ;;  %v1336_v3 = vmul.f32 %v2807_v5, %v2807_v5  ;;  %1986 = vmatmul.msk.f32.vlgmr.msra.gmra.mxu1 %vm151_vm9, %v2690_v2 }
 0x3dc   :  { %1311 = vadd.xlane.f32.xlu0 %v1310_v9 }
 0x3dd   :  { %v1350_v16 = vsel %vm296_vm3, %v1336_v3, 0.0 }
 0x3de   :  { %1351 = vadd.xlane.f32.xlu1 %v1350_v16  ;;  %v1280_v17 = vpop.f32.mrf.mxu3 }
 0x3df   :  { %v1281_v14 = vadd.f32 %v1280_v17, %v1215_v8  ;;  %v2882_v8 = vadd.f32 %v914_v13, %v860_v51  ;;  %v923_v3 = vpop.f32.mrf.mxu1  ;;  %v942_v17 = vsel %vm926_vm1, %v2884_v4, 0.0  ;;  %v964_v13 = vmul.f32 %v2884_v4, %v2884_v4 }
 0x3e1   :  { %v2815_v37 = vadd.f32 %v2776_v49, %v1281_v14  ;;  %v939_v9 = vsel %vm926_vm1, %v2882_v8, 0.0  ;;  %v2894_v14 = vadd.f32 %v923_v3, %v860_v51 }
 0x3e3   :  { %v1313_v38 = vsel %vm296_vm3, %v2815_v37, 0.0  ;;  %v1337_v21 = vmul.f32 %v2815_v37, %v2815_v37  ;;  %1987 = vmatmul.msk.f32.gmra.mxu1 %vm151_vm9, %v2704_v15 }
 0x3e4   :  { %1314 = vadd.xlane.f32.xlu2 %v1313_v38  ;;  %v959_v38 = vmul.f32 %v2851_v57, %v2851_v57 }
 0x3e5   :  { %v1353_v29 = vsel %vm296_vm3, %v1337_v21, 0.0  ;;  %v948_v21 = vsel %vm926_vm1, %v2894_v14, 0.0 }
 0x3e6   :  { %1354 = vadd.xlane.f32.xlu0 %v1353_v29  ;;  %v1283_v30 = vpop.f32.mrf.mxu3  ;;  %v967_v29 = vsel %vm926_vm1, %v959_v38, 0.0 }
 0x3e7   :  { %v1284_v31 = vadd.f32 %v1283_v30, %v1218_v62  ;;  %v960_v62 = vmul.f32 %v2864_v48, %v2864_v48 }
 0x3e9   :  { %v2823_v23 = vadd.f32 %v2776_v49, %v1284_v31  ;;  %v970_v33 = vsel %vm926_vm1, %v960_v62, 0.0  ;;  %v963_v31 = vmul.f32 %v2882_v8, %v2882_v8 }
 0x3eb   :  { %v1316_v27 = vsel %vm296_vm3, %v2823_v23, 0.0  ;;  %v1338_v20 = vmul.f32 %v2823_v23, %v2823_v23  ;;  %1988 = vmatmul.msk.f32.gmra.mxu1 %vm151_vm9, %v2717_v41  ;;  %v2950_v41 = vperm.slane %v2773_v47, 2 }
 0x3ec   :  { %1317 = vadd.xlane.f32.xlu1 %v1316_v27 }
 0x3ed   :  { %v1356_v35 = vsel %vm296_vm3, %v1338_v20, 0.0  ;;  %v979_v20 = vsel %vm926_vm1, %v963_v31, 0.0  ;;  %v2946_v31 = vperm.slane %v2773_v47, 1 }
 0x3ee   :  { %1357 = vadd.xlane.f32.xlu2 %v1356_v35  ;;  %v1286_v40 = vpop.f32.mrf.mxu3 }
 0x3ef   :  { %v1287_v43 = vadd.f32 %v1286_v40, %v1221_v12  ;;  %v962_v12 = vmul.f32 %v2868_v1, %v2868_v1 }
 0x3f1   :  { %v2831_v44 = vadd.f32 %v2776_v49, %v1287_v43  ;;  %v976_v35 = vsel %vm926_vm1, %v962_v12, 0.0  ;;  %v966_v43 = vmul.f32 %v2894_v14, %v2894_v14 }
 0x3f3   :  { %v1319_v26 = vsel %vm296_vm3, %v2831_v44, 0.0  ;;  %v1339_v42 = vmul.f32 %v2831_v44, %v2831_v44  ;;  %1989 = vmatmul.msk.f32.gmra.mxu1 %vm151_vm9, %v2728_v36 }
 0x3f4   :  { %1320 = vadd.xlane.f32.xlu0 %v1319_v26  ;;  %v982_v26 = vsel %vm926_vm1, %v964_v13, 0.0 }
 0x3f5   :  { %v1359_v24 = vsel %vm296_vm3, %v1339_v42, 0.0 }
 0x3f6   :  { %1360 = vadd.xlane.f32.xlu1 %v1359_v24  ;;  %v1289_v18 = vpop.f32.mrf.mxu3 }
 0x3f7   :  { %v1290_v60 = vadd.f32 %v1289_v18, %v1224_v34  ;;  %v988_v34 = vsel %vm926_vm1, %v966_v43, 0.0 }
 0x3f9   :  { %v2854_v0 = vadd.f32 %v2776_v49, %v1290_v60  ;;  %v2866_v49 = vadd.f32 %v908_v28, %v860_v51  ;;  %v2886_v28 = vadd.f32 %v920_v55, %v860_v51  ;;  %v1521_v51 = vld [vmem:[%s3410_s16 + $0x8] sm:$0xff] }
 0x3fa   :  { %1606 = vmatpush.msra.mxu0 %v1521_v51 }
 0x3fb   :  { %v1322_v58 = vsel %vm296_vm3, %v2854_v0, 0.0  ;;  %v1340_v59 = vmul.f32 %v2854_v0, %v2854_v0  ;;  %v933_v25 = vsel %vm926_vm1, %v2866_v49, 0.0  ;;  %v945_v16 = vsel %vm926_vm1, %v2886_v28, 0.0  ;;  %1990 = vmatmul.msk.f32.gmra.mxu1 %vm151_vm9, %v2737_v39 }
 0x3fc   :  { %1323 = vadd.xlane.f32.xlu2 %v1322_v58  ;;  %v961_v30 = vmul.f32 %v2866_v49, %v2866_v49  ;;  %v965_v40 = vmul.f32 %v2886_v28, %v2886_v28  ;;  %v1520_v58 = vld [vmem:[%s3410_s16] sm:$0xff]  ;;  %s2101_s16 = smov 6  }
 0x3fd   :  { %v1362_v32 = vsel %vm296_vm3, %v1340_v59, 0.0  ;;  %1607 = vmatpush.msra.mxu0 %v1520_v58 }
 0x3fe   :  { %928 = vadd.xlane.f32.xlu1 %v927_v61  ;;  %1363 = vadd.xlane.f32.xlu0 %v1362_v32  ;;  %v973_v27 = vsel %vm926_vm1, %v961_v30, 0.0  ;;  %v985_v42 = vsel %vm926_vm1, %v965_v40, 0.0 }
 0x403   :  { %1991 = vmatmul.msk.f32.gmra.mxu1 %vm151_vm9, %v2744_v11 }
 0x404   :  { %931 = vadd.xlane.f32.xlu2 %v930_v6 }
 0x406   :  { %937 = vadd.xlane.f32.xlu1 %v936_v7  ;;  %934 = vadd.xlane.f32.xlu0 %v933_v25 }
 0x40b   :  { %1992 = vmatmul.msk.f32.gmra.mxu1 %vm151_vm9, %v2751_v22 }
 0x40c   :  { %940 = vadd.xlane.f32.xlu2 %v939_v9 }
 0x40e   :  { %946 = vadd.xlane.f32.xlu1 %v945_v16  ;;  %943 = vadd.xlane.f32.xlu0 %v942_v17 }
 0x413   :  { %1993 = vmatmul.msk.f32.gmra.mxu1 %vm151_vm9, %v2758_v50 }
 0x414   :  { %949 = vadd.xlane.f32.xlu2 %v948_v21 }
 0x416   :  { %971 = vadd.xlane.f32.xlu1 %v970_v33  ;;  %968 = vadd.xlane.f32.xlu0 %v967_v29 }
 0x41c   :  { %974 = vadd.xlane.f32.xlu2 %v973_v27 }
 0x41e   :  { %980 = vadd.xlane.f32.xlu1 %v979_v20  ;;  %977 = vadd.xlane.f32.xlu0 %v976_v35 }
 0x424   :  { %983 = vadd.xlane.f32.xlu2 %v982_v26 }
 0x426   :  { %986 = vadd.xlane.f32.xlu0 %v985_v42  ;;  %989 = vadd.xlane.f32.xlu1 %v988_v34 }
 0x435   :  { %v1303_v24 = vpop.xlane.xlu0 %1302 }
 0x436   :  { %v1325_v18 = vmul.f32 0.03125, %v1303_v24 }
 0x437   :  { %v1343_v52 = vpop.xlane.xlu1 %1342 }
 0x438   :  { %v1373_v53 = vmul.f32 %v1325_v18, %v1325_v18  ;;  %v1365_v60 = vmul.f32 0.03125, %v1343_v52  ;;  %v1389_v12 = vsub.f32 %v2779_v46, %v1325_v18 }
 0x43a   :  { %v1381_v59 = vsub.f32 %v1365_v60, %v1373_v53 }
 0x43c   :  { %v1397_v61 = vadd.f32 1e-05, %v1381_v59 }
 0x43d   :  { %v1306_v32 = vpop.xlane.xlu2 %1305 }
 0x43e   :  { %2044 = vrsqrt.f32 %v1397_v61  ;;  %v2933_v55 = vmul.f32 0.03125, %v1306_v32  ;;  %vm1411_vm4 = vweird.f32 %v1397_v61 }
 0x43f   :  { %v1346_v6 = vpop.xlane.xlu0 %1345 }
 0x440   :  { %v1374_v7 = vmul.f32 %v2933_v55, %v2933_v55  ;;  %v1366_v25 = vmul.f32 0.03125, %v1346_v6  ;;  %v1390_v36 = vsub.f32 %v2789_v56, %v2933_v55 }
 0x442   :  { %v1382_v9 = vsub.f32 %v1366_v25, %v1374_v7 }
 0x444   :  { %v2045_v45 = vpop.eup %2044  ;;  %v1398_v16 = vadd.f32 1e-05, %v1382_v9 }
 0x445   :  { %v1406_v63 = vmul.f32 %v2045_v45, %v1397_v61  ;;  %vm1412_vm2 = vweird.f32 %v2045_v45 }
 0x446   :  { %2046 = vrsqrt.f32 %v1398_v16  ;;  %vm1413_vm5 = vmor %vm1411_vm4, %vm1412_vm2  ;;  %vm1421_vm7 = vweird.f32 %v1398_v16 }
 0x447   :  { %v1407_v3 = vmul.f32 %v2045_v45, %v1406_v63  ;;  %v1309_v17 = vpop.xlane.xlu1 %1308 }
 0x448   :  { %v2939_v62 = vmul.f32 0.03125, %v1309_v17 }
 0x449   :  { %v1408_v2 = vmul.f32 0.5, %v1407_v3  ;;  %v1349_v38 = vpop.xlane.xlu2 %1348 }
 0x44a   :  { %v1375_v15 = vmul.f32 %v2939_v62, %v2939_v62  ;;  %v1367_v33 = vmul.f32 0.03125, %v1349_v38  ;;  %v1391_v39 = vsub.f32 %v2797_v19, %v2939_v62 }
 0x44b   :  { %v1409_v21 = vsub.f32 1.5, %v1408_v2 }
 0x44c   :  { %v1383_v30 = vsub.f32 %v1367_v33, %v1375_v15  ;;  %v2047_v27 = vpop.eup %2046 }
 0x44d   :  { %v1410_v29 = vmul.f32 %v2045_v45, %v1409_v21  ;;  %v1416_v40 = vmul.f32 %v2047_v27, %v1398_v16  ;;  %vm1422_vm6 = vweird.f32 %v2047_v27 }
 0x44e   :  { %v1399_v35 = vadd.f32 1e-05, %v1383_v30  ;;  %vm1423_vm8 = vmor %vm1421_vm7, %vm1422_vm6 }
 0x44f   :  { %v1414_v20 = vsel %vm1413_vm5, %v2045_v45, %v1410_v29  ;;  %v1312_v43 = vpop.xlane.xlu0 %1311  ;;  %v1417_v34 = vmul.f32 %v2047_v27, %v1416_v40 }
 0x450   :  { %v1485_v13 = vmul.f32 %v1414_v20, %v1389_v12  ;;  %2048 = vrsqrt.f32 %v1399_v35  ;;  %v2952_v26 = vmul.f32 0.03125, %v1312_v43  ;;  %vm1431_vm12 = vweird.f32 %v1399_v35 }
 0x451   :  { %v1352_v51 = vpop.xlane.xlu1 %1351  ;;  %v1418_v18 = vmul.f32 0.5, %v1417_v34 }
 0x452   :  { %v1494_v42 = vmul.f32 %v2946_v31, %v1485_v13  ;;  %v1376_v46 = vmul.f32 %v2952_v26, %v2952_v26  ;;  %v1368_v24 = vmul.f32 0.03125, %v1352_v51 }
 0x453   :  { %v1419_v53 = vsub.f32 1.5, %v1418_v18 }
 0x454   :  { %v1503_v47 = vadd.f32 %v2950_v41, %v1494_v42  ;;  %v1384_v52 = vsub.f32 %v1368_v24, %v1376_v46 }
 0x455   :  { %v1420_v59 = vmul.f32 %v2047_v27, %v1419_v53 }
 0x456   :  { %v1511_v60 = vmax.f32 %v1503_v47, 0.0  ;;  %v2049_v54 = vpop.eup %2048  ;;  %v1400_v58 = vadd.f32 1e-05, %v1384_v52  ;;  %v1392_v52 = vsub.f32 %v2807_v5, %v2952_v26 }
 0x457   :  { %v1426_v61 = vmul.f32 %v2049_v54, %v1399_v35  ;;  %v1315_v32 = vpop.xlane.xlu2 %1314  ;;  %v1424_v45 = vsel %vm1423_vm8, %v2047_v27, %v1420_v59  ;;  %vm1432_vm10 = vweird.f32 %v2049_v54 }
 0x458   :  { %1994 = vmatmul.msk.f32.vlgmr.msra.gmra.mxu0 %vm296_vm3, %v1511_v60  ;;  %2050 = vrsqrt.f32 %v1400_v58  ;;  %v2963_v6 = vmul.f32 0.03125, %v1315_v32  ;;  %v1486_v3 = vmul.f32 %v1424_v45, %v1390_v36  ;;  %vm1433_vm13 = vmor %vm1431_vm12, %vm1432_vm10  ;;  %vm1441_vm15 = vweird.f32 %v1400_v58 }
 0x459   :  { %v1427_v7 = vmul.f32 %v2049_v54, %v1426_v61  ;;  %v1355_v25 = vpop.xlane.xlu0 %1354 }
 0x45a   :  { %v1377_v63 = vmul.f32 %v2963_v6, %v2963_v6  ;;  %v1369_v9 = vmul.f32 0.03125, %v1355_v25  ;;  %v1495_v2 = vmul.f32 %v2946_v31, %v1486_v3 }
 0x45b   :  { %v1428_v16 = vmul.f32 0.5, %v1427_v7 }
 0x45c   :  { %v1385_v17 = vsub.f32 %v1369_v9, %v1377_v63  ;;  %v1504_v21 = vadd.f32 %v2950_v41, %v1495_v2 }
 0x45d   :  { %v1429_v56 = vsub.f32 1.5, %v1428_v16 }
 0x45e   :  { %v2051_v55 = vpop.eup %2050  ;;  %v1401_v38 = vadd.f32 1e-05, %v1385_v17  ;;  %v1512_v12 = vmax.f32 %v1504_v21, 0.0 }
 0x45f   :  { %v1430_v15 = vmul.f32 %v2049_v54, %v1429_v56  ;;  %v1436_v33 = vmul.f32 %v2051_v55, %v1400_v58  ;;  %v1318_v29 = vpop.xlane.xlu1 %1317  ;;  %vm1442_vm14 = vweird.f32 %v2051_v55  ;;  %v1393_v56 = vsub.f32 %v2815_v37, %v2963_v6 }
 0x460   :  { %2052 = vrsqrt.f32 %v1401_v38  ;;  %v2973_v30 = vmul.f32 0.03125, %v1318_v29  ;;  %1995 = vmatmul.msk.f32.gmra.mxu0 %vm296_vm3, %v1512_v12  ;;  %vm1443_vm0 = vmor %vm1441_vm15, %vm1442_vm14  ;;  %vm1451_vm2 = vweird.f32 %v1401_v38 }
 0x461   :  { %v1437_v27 = vmul.f32 %v2051_v55, %v1436_v33  ;;  %v1358_v20 = vpop.xlane.xlu2 %1357  ;;  %v1434_v13 = vsel %vm1433_vm13, %v2049_v54, %v1430_v15 }
 0x462   :  { %v1378_v40 = vmul.f32 %v2973_v30, %v2973_v30  ;;  %v1370_v35 = vmul.f32 0.03125, %v1358_v20  ;;  %v1487_v43 = vmul.f32 %v1434_v13, %v1391_v39 }
 0x463   :  { %v1438_v42 = vmul.f32 0.5, %v1437_v27 }
 0x464   :  { %v1386_v19 = vsub.f32 %v1370_v35, %v1378_v40  ;;  %v1496_v62 = vmul.f32 %v2946_v31, %v1487_v43 }
 0x465   :  { %v1439_v34 = vsub.f32 1.5, %v1438_v42  ;;  %v1394_v42 = vsub.f32 %v2823_v23, %v2973_v30 }
 0x466   :  { %v2053_v51 = vpop.eup %2052  ;;  %v1402_v46 = vadd.f32 1e-05, %v1386_v19  ;;  %v1505_v24 = vadd.f32 %v2950_v41, %v1496_v62 }
 0x467   :  { %v1440_v18 = vmul.f32 %v2051_v55, %v1439_v34  ;;  %v1446_v11 = vmul.f32 %v2053_v51, %v1401_v38  ;;  %v1321_v47 = vpop.xlane.xlu0 %1320  ;;  %vm1452_vm1 = vweird.f32 %v2053_v51 }
 0x468   :  { %2054 = vrsqrt.f32 %v1402_v46  ;;  %v2984_v53 = vmul.f32 0.03125, %v1321_v47  ;;  %v1513_v60 = vmax.f32 %v1505_v24, 0.0  ;;  %vm1453_vm4 = vmor %vm1451_vm2, %vm1452_vm1  ;;  %vm1461_vm6 = vweird.f32 %v1402_v46 }
 0x469   :  { %v1447_v54 = vmul.f32 %v2053_v51, %v1446_v11  ;;  %v1361_v59 = vpop.xlane.xlu1 %1360  ;;  %v1444_v61 = vsel %vm1443_vm0, %v2051_v55, %v1440_v18 }
 0x46a   :  { %v1379_v32 = vmul.f32 %v2984_v53, %v2984_v53  ;;  %v1371_v58 = vmul.f32 0.03125, %v1361_v59  ;;  %1996 = vmatmul.msk.f32.gmra.mxu0 %vm296_vm3, %v1513_v60  ;;  %v1488_v36 = vmul.f32 %v1444_v61, %v1392_v52  ;;  %v1395_v30 = vsub.f32 %v2831_v44, %v2984_v53 }
 0x46b   :  { %v1448_v7 = vmul.f32 0.5, %v1447_v54 }
 0x46c   :  { %v1387_v5 = vsub.f32 %v1371_v58, %v1379_v32  ;;  %v1497_v26 = vmul.f32 %v2946_v31, %v1488_v36 }
 0x46d   :  { %v1449_v25 = vsub.f32 1.5, %v1448_v7 }
 0x46e   :  { %v2055_v45 = vpop.eup %2054  ;;  %v1403_v63 = vadd.f32 1e-05, %v1387_v5  ;;  %v1506_v9 = vadd.f32 %v2950_v41, %v1497_v26 }
 0x46f   :  { %v1450_v3 = vmul.f32 %v2053_v51, %v1449_v25  ;;  %v1456_v22 = vmul.f32 %v2055_v45, %v1402_v46  ;;  %v1324_v16 = vpop.xlane.xlu2 %1323  ;;  %vm1462_vm5 = vweird.f32 %v2055_v45 }
 0x470   :  { %2056 = vrsqrt.f32 %v1403_v63  ;;  %v2993_v17 = vmul.f32 0.03125, %v1324_v16  ;;  %v1514_v2 = vmax.f32 %v1506_v9, 0.0  ;;  %vm1463_vm9 = vmor %vm1461_vm6, %vm1462_vm5  ;;  %vm1471_vm8 = vweird.f32 %v1403_v63 }
 0x471   :  { %v1457_v55 = vmul.f32 %v2055_v45, %v1456_v22  ;;  %v1364_v21 = vpop.xlane.xlu0 %1363  ;;  %v929_v15 = vpop.xlane.xlu1 %928  ;;  %v1454_v33 = vsel %vm1453_vm4, %v2053_v51, %v1450_v3 }
 0x472   :  { %v1380_v38 = vmul.f32 %v2993_v17, %v2993_v17  ;;  %v1372_v29 = vmul.f32 0.03125, %v1364_v21  ;;  %1997 = vmatmul.msk.f32.gmra.mxu0 %vm296_vm3, %v1514_v2  ;;  %v1489_v12 = vmul.f32 %v1454_v33, %v1393_v56  ;;  %v1396_v22 = vsub.f32 %v2854_v0, %v2993_v17 }
 0x473   :  { %v1458_v39 = vmul.f32 0.5, %v1457_v55 }
 0x474   :  { %v1388_v27 = vsub.f32 %v1372_v29, %v1380_v38  ;;  %v1498_v37 = vmul.f32 %v2946_v31, %v1489_v12 }
 0x475   :  { %v1459_v20 = vsub.f32 1.5, %v1458_v39 }
 0x476   :  { %v2057_v6 = vpop.eup %2056  ;;  %v1404_v13 = vadd.f32 1e-05, %v1388_v27  ;;  %v1507_v50 = vadd.f32 %v2950_v41, %v1498_v37 }
 0x477   :  { %v1460_v40 = vmul.f32 %v2055_v45, %v1459_v20  ;;  %v1466_v35 = vmul.f32 %v2057_v6, %v1403_v63  ;;  %v932_v43 = vpop.xlane.xlu2 %931  ;;  %vm1472_vm7 = vweird.f32 %v2057_v6  ;;  %v3013_v63 = vmul.f32 0.2, %v929_v15 }
 0x478   :  { %2058 = vrsqrt.f32 %v1404_v13  ;;  %v1515_v51 = vmax.f32 %v1507_v50, 0.0  ;;  %vm1473_vm10 = vmor %vm1471_vm8, %vm1472_vm7  ;;  %v3015_v9 = vmul.f32 0.2, %v932_v43  ;;  %vm1481_vm13 = vweird.f32 %v1404_v13 }
 0x479   :  { %v1467_v19 = vmul.f32 %v2057_v6, %v1466_v35  ;;  %v935_v62 = vpop.xlane.xlu0 %934  ;;  %v938_v34 = vpop.xlane.xlu1 %937  ;;  %v1464_v24 = vsel %vm1463_vm9, %v2055_v45, %v1460_v40  ;;  %v999_v21 = vmul.f32 %v3013_v63, %v3013_v63 }
 0x47a   :  { %1998 = vmatmul.msk.f32.gmra.mxu0 %vm296_vm3, %v1515_v51  ;;  %v1490_v11 = vmul.f32 %v1464_v24, %v1394_v42  ;;  %v1000_v15 = vmul.f32 %v3015_v9, %v3015_v9  ;;  %v3025_v39 = vmul.f32 0.2, %v935_v62  ;;  %v3027_v0 = vmul.f32 0.2, %v938_v34 }
 0x47b   :  { %v1468_v18 = vmul.f32 0.5, %v1467_v19 }
 0x47c   :  { %v1499_v46 = vmul.f32 %v2946_v31, %v1490_v11  ;;  %v1001_v35 = vmul.f32 %v3025_v39, %v3025_v39  ;;  %v1002_v50 = vmul.f32 %v3027_v0, %v3027_v0 }
 0x47d   :  { %v1469_v47 = vsub.f32 1.5, %v1468_v18 }
 0x47e   :  { %v2059_v52 = vpop.eup %2058  ;;  %v1508_v23 = vadd.f32 %v2950_v41, %v1499_v46 }
 0x47f   :  { %v1470_v60 = vmul.f32 %v2057_v6, %v1469_v47  ;;  %v1476_v54 = vmul.f32 %v2059_v52, %v1404_v13  ;;  %v941_v59 = vpop.xlane.xlu2 %940  ;;  %vm1482_vm12 = vweird.f32 %v2059_v52 }
 0x480   :  { %v1516_v36 = vmax.f32 %v1508_v23, 0.0  ;;  %vm1483_vm14 = vmor %vm1481_vm13, %vm1482_vm12  ;;  %v3030_v20 = vmul.f32 0.2, %v941_v59 }
 0x481   :  { %v1477_v61 = vmul.f32 %v2059_v52, %v1476_v54  ;;  %v944_v32 = vpop.xlane.xlu0 %943  ;;  %v947_v58 = vpop.xlane.xlu1 %946  ;;  %v1474_v7 = vsel %vm1473_vm10, %v2057_v6, %v1470_v60 }
 0x482   :  { %1999 = vmatmul.msk.f32.gmra.mxu0 %vm296_vm3, %v1516_v36  ;;  %v1491_v26 = vmul.f32 %v1474_v7, %v1395_v30  ;;  %v1003_v62 = vmul.f32 %v3030_v20, %v3030_v20  ;;  %v3046_v24 = vmul.f32 0.2, %v944_v32  ;;  %v3050_v46 = vmul.f32 0.2, %v947_v58 }
 0x483   :  { %v1478_v5 = vmul.f32 0.5, %v1477_v61 }
 0x484   :  { %v1500_v45 = vmul.f32 %v2946_v31, %v1491_v26  ;;  %v1004_v32 = vmul.f32 %v3046_v24, %v3046_v24  ;;  %v1005_v36 = vmul.f32 %v3050_v46, %v3050_v46 }
 0x485   :  { %v1479_v25 = vsub.f32 1.5, %v1478_v5 }
 0x486   :  { %v1509_v53 = vadd.f32 %v2950_v41, %v1500_v45 }
 0x487   :  { %v1480_v3 = vmul.f32 %v2059_v52, %v1479_v25  ;;  %v950_v44 = vpop.xlane.xlu2 %949 }
 0x488   :  { %v1517_v56 = vmax.f32 %v1509_v53, 0.0  ;;  %v3054_v60 = vmul.f32 0.2, %v950_v44 }
 0x489   :  { %v969_v16 = vpop.xlane.xlu0 %968  ;;  %v972_v2 = vpop.xlane.xlu1 %971  ;;  %v1484_v55 = vsel %vm1483_vm14, %v2059_v52, %v1480_v3 }
 0x48a   :  { %v991_v33 = vmul.f32 0.2, %v969_v16  ;;  %v992_v38 = vmul.f32 0.2, %v972_v2  ;;  %2000 = vmatmul.msk.f32.gmra.mxu0 %vm296_vm3, %v1517_v56  ;;  %v1492_v29 = vmul.f32 %v1484_v55, %v1396_v22  ;;  %v1006_v45 = vmul.f32 %v3054_v60, %v3054_v60 }
 0x48b   :  { %v3074_v22 = vperm.slane %v2836_v10, 1  ;;  %v1015_v16 = vsub.f32 %v2851_v57, %v3013_v63 }
 0x48c   :  { %v1007_v12 = vsub.f32 %v991_v33, %v999_v21  ;;  %v1008_v27 = vsub.f32 %v992_v38, %v1000_v15  ;;  %v1501_v17 = vmul.f32 %v2946_v31, %v1492_v29  ;;  %v1016_v21 = vsub.f32 %v2864_v48, %v3015_v9 }
 0x48d   :  { %v1017_v29 = vsub.f32 %v2866_v49, %v3025_v39 }
 0x48e   :  { %v3032_v37 = vadd.f32 1e-05, %v1007_v12  ;;  %v3034_v6 = vadd.f32 1e-05, %v1008_v27  ;;  %v1510_v40 = vadd.f32 %v2950_v41, %v1501_v17 }
 0x48f   :  { %v975_v13 = vpop.xlane.xlu2 %974 }
 0x490   :  { %2060 = vrsqrt.f32 %v3032_v37  ;;  %v993_v43 = vmul.f32 0.2, %v975_v13  ;;  %v1518_v19 = vmax.f32 %v1510_v40, 0.0  ;;  %vm1037_vm0 = vweird.f32 %v3032_v37 }
 0x491   :  { %2062 = vrsqrt.f32 %v3034_v6  ;;  %v978_v31 = vpop.xlane.xlu0 %977  ;;  %v981_v42 = vpop.xlane.xlu1 %980  ;;  %vm1047_vm2 = vweird.f32 %v3034_v6 }
 0x492   :  { %v1009_v34 = vsub.f32 %v993_v43, %v1001_v35  ;;  %v994_v51 = vmul.f32 0.2, %v978_v31  ;;  %v995_v41 = vmul.f32 0.2, %v981_v42  ;;  %2001 = vmatmul.msk.f32.gmra.mxu0 %vm296_vm3, %v1518_v19 }
 0x494   :  { %v3048_v18 = vadd.f32 1e-05, %v1009_v34  ;;  %v1010_v11 = vsub.f32 %v994_v51, %v1002_v50  ;;  %v1011_v47 = vsub.f32 %v995_v41, %v1003_v62  ;;  %v1018_v62 = vsub.f32 %v2868_v1, %v3027_v0 }
 0x496   :  { %v3052_v52 = vpop.eup %2060  ;;  %2064 = vrsqrt.f32 %v3048_v18  ;;  %v3057_v54 = vadd.f32 1e-05, %v1010_v11  ;;  %v3059_v59 = vadd.f32 1e-05, %v1011_v47  ;;  %vm1057_vm6 = vweird.f32 %v3048_v18 }
 0x497   :  { %v2063_v23 = vpop.eup %2062  ;;  %v1032_v30 = vmul.f32 %v3052_v52, %v3032_v37  ;;  %v984_v61 = vpop.xlane.xlu2 %983  ;;  %vm1038_vm3 = vweird.f32 %v3052_v52 }
 0x498   :  { %v1042_v58 = vmul.f32 %v2063_v23, %v3034_v6  ;;  %2066 = vrsqrt.f32 %v3057_v54  ;;  %v996_v5 = vmul.f32 0.2, %v984_v61  ;;  %vm1048_vm15 = vweird.f32 %v2063_v23  ;;  %vm1039_vm1 = vmor %vm1037_vm0, %vm1038_vm3 }
 0x499   :  { %v1033_v7 = vmul.f32 %v3052_v52, %v1032_v30  ;;  %2068 = vrsqrt.f32 %v3059_v59  ;;  %v987_v26 = vpop.xlane.xlu0 %986  ;;  %v990_v25 = vpop.xlane.xlu1 %989  ;;  %vm1049_vm4 = vmor %vm1047_vm2, %vm1048_vm15  ;;  %v3115_v30 = vperm.slane %v2836_v10, 2  ;;  %vm1067_vm10 = vweird.f32 %v3057_v54 }
 0x49a   :  { %v1043_v3 = vmul.f32 %v2063_v23, %v1042_v58  ;;  %v997_v44 = vmul.f32 0.2, %v987_v26  ;;  %v998_v53 = vmul.f32 0.2, %v990_v25  ;;  %v1012_v56 = vsub.f32 %v996_v5, %v1004_v32 }
 0x49b   :  { %v1034_v2 = vmul.f32 0.5, %v1033_v7  ;;  %vm1077_vm13 = vweird.f32 %v3059_v59 }
 0x49c   :  { %v3078_v55 = vpop.eup %2064  ;;  %v1044_v15 = vmul.f32 0.5, %v1043_v3  ;;  %v1013_v33 = vsub.f32 %v997_v44, %v1005_v36  ;;  %v1014_v38 = vsub.f32 %v998_v53, %v1006_v45  ;;  %v3086_v17 = vadd.f32 1e-05, %v1012_v56 }
 0x49d   :  { %v1035_v12 = vsub.f32 1.5, %v1034_v2  ;;  %v1052_v27 = vmul.f32 %v3078_v55, %v3048_v18  ;;  %vm1058_vm5 = vweird.f32 %v3078_v55  ;;  %v1019_v44 = vsub.f32 %v2882_v8, %v3030_v20 }
 0x49e   :  { %v3088_v57 = vpop.eup %2066  ;;  %v1045_v63 = vsub.f32 1.5, %v1044_v15  ;;  %v3091_v13 = vadd.f32 1e-05, %v1013_v33  ;;  %v3093_v48 = vadd.f32 1e-05, %v1014_v38  ;;  %2070 = vrsqrt.f32 %v3086_v17  ;;  %vm3124_vm7 = vmor %vm1057_vm6, %vm1058_vm5 }
 0x49f   :  { %v3095_v9 = vpop.eup %2068  ;;  %v1036_v40 = vmul.f32 %v3052_v52, %v1035_v12  ;;  %v1053_v35 = vmul.f32 %v3078_v55, %v1052_v27  ;;  %v1062_v43 = vmul.f32 %v3088_v57, %v3057_v54  ;;  %vm1068_vm9 = vweird.f32 %v3088_v57 }
 0x4a0   :  { %v1046_v50 = vmul.f32 %v2063_v23, %v1045_v63  ;;  %v1072_v31 = vmul.f32 %v3095_v9, %v3059_v59  ;;  %2072 = vrsqrt.f32 %v3091_v13  ;;  %vm1078_vm8 = vweird.f32 %v3095_v9  ;;  %vm3138_vm12 = vmor %vm1067_vm10, %vm1068_vm9 }
 0x4a1   :  { %v1054_v42 = vmul.f32 0.5, %v1053_v35  ;;  %v1063_v19 = vmul.f32 %v3088_v57, %v1062_v43  ;;  %2074 = vrsqrt.f32 %v3093_v48  ;;  %v1040_v41 = vsel %vm1039_vm1, %v3052_v52, %v1036_v40  ;;  %vm1079_vm14 = vmor %vm1077_vm13, %vm1078_vm8 }
 0x4a2   :  { %v1073_v37 = vmul.f32 %v3095_v9, %v1072_v31  ;;  %v1050_v6 = vsel %vm1049_vm4, %v2063_v23, %v1046_v50  ;;  %v1111_v47 = vmul.f32 %v1040_v41, %v1015_v16  ;;  %vm1087_vm3 = vweird.f32 %v3086_v17  ;;  %v1544_v41 = vpop.f32.mrf.mxu1 }
 0x4a3   :  { %v1055_v34 = vsub.f32 1.5, %v1054_v42  ;;  %v1064_v51 = vmul.f32 0.5, %v1063_v19  ;;  %v1112_v61 = vmul.f32 %v1050_v6, %v1016_v21  ;;  %v1020_v50 = vsub.f32 %v2884_v4, %v3046_v24  ;;  %v3203_v6 = vld [vmem:[%s3411_s18] sm:$0x7] }
 0x4a4   :  { %v1074_v11 = vmul.f32 0.5, %v1073_v37  ;;  %v3120_v32 = vpop.eup %2070  ;;  %v1120_v10 = vmul.f32 %v3074_v22, %v1111_v47  ;;  %vm1097_vm4 = vweird.f32 %v3091_v13  ;;  %v1021_v42 = vsub.f32 %v2886_v28, %v3050_v46 }
 0x4a5   :  { %v1056_v1 = vmul.f32 %v3078_v55, %v1055_v34  ;;  %v1065_v0 = vsub.f32 1.5, %v1064_v51  ;;  %v1121_v58 = vmul.f32 %v3074_v22, %v1112_v61  ;;  %v1082_v7 = vmul.f32 %v3120_v32, %v3086_v17 }
 0x4a6   :  { %v1075_v23 = vsub.f32 1.5, %v1074_v11  ;;  %v2073_v36 = vpop.eup %2072  ;;  %v1129_v54 = vadd.f32 %v3115_v30, %v1120_v10  ;;  %vm1088_vm15 = vweird.f32 %v3120_v32  ;;  %vm1107_vm6 = vweird.f32 %v3093_v48 }
 0x4a7   :  { %v1066_v18 = vmul.f32 %v3088_v57, %v1065_v0  ;;  %v1060_v5 = vsel %vm3124_vm7, %v3078_v55, %v1056_v1  ;;  %v2075_v26 = vpop.eup %2074  ;;  %v1092_v3 = vmul.f32 %v2073_v36, %v3091_v13  ;;  %v1083_v53 = vmul.f32 %v3120_v32, %v1082_v7  ;;  %vm1089_vm2 = vmor %vm1087_vm3, %vm1088_vm15 }
 0x4a8   :  { %v1076_v45 = vmul.f32 %v3095_v9, %v1075_v23  ;;  %v1102_v16 = vmul.f32 %v2075_v26, %v3093_v48  ;;  %v1130_v2 = vadd.f32 %v3115_v30, %v1121_v58  ;;  %1868 = vrot.lane.b32.xlu0 %v1129_v54, %s2101_s16  ;;  %v1113_v59 = vmul.f32 %v1060_v5, %v1017_v29 }
 0x4a9   :  { %v1093_v56 = vmul.f32 %v2073_v36, %v1092_v3  ;;  %v1070_v8 = vsel %vm3138_vm12, %v3088_v57, %v1066_v18  ;;  %v1084_v55 = vmul.f32 0.5, %v1083_v53  ;;  %vm1098_vm0 = vweird.f32 %v2073_v36 }
 0x4aa   :  { %v1080_v20 = vsel %vm1079_vm14, %v3095_v9, %v1076_v45  ;;  %v1103_v21 = vmul.f32 %v2075_v26, %v1102_v16  ;;  %1870 = vrot.lane.b32.xlu1 %v1130_v2, %s2101_s16  ;;  %v1114_v15 = vmul.f32 %v1070_v8, %v1018_v62  ;;  %v1122_v49 = vmul.f32 %v3074_v22, %v1113_v59  ;;  %vm1099_vm5 = vmor %vm1097_vm4, %vm1098_vm0 }
 0x4ab   :  { %v1115_v33 = vmul.f32 %v1080_v20, %v1019_v44  ;;  %v1094_v38 = vmul.f32 0.5, %v1093_v56  ;;  %v1085_v39 = vsub.f32 1.5, %v1084_v55  ;;  %vm1108_vm1 = vweird.f32 %v2075_v26 }
 0x4ac   :  { %v1104_v29 = vmul.f32 0.5, %v1103_v21  ;;  %v1123_v12 = vmul.f32 %v3074_v22, %v1114_v15  ;;  %v1131_v63 = vadd.f32 %v3115_v30, %v1122_v49  ;;  %v1022_v4 = vsub.f32 %v2894_v14, %v3054_v60  ;;  %vm1109_vm9 = vmor %vm1107_vm6, %vm1108_vm1 }
 0x4ad   :  { %v1124_v27 = vmul.f32 %v3074_v22, %v1115_v33  ;;  %v1095_v57 = vsub.f32 1.5, %v1094_v38  ;;  %v1086_v9 = vmul.f32 %v3120_v32, %v1085_v39  ;;  %v3206_v11 = vperm.slane %v3203_v6, 0 }
 0x4ae   :  { %v1105_v40 = vsub.f32 1.5, %v1104_v29  ;;  %v1132_v35 = vadd.f32 %v3115_v30, %v1123_v12  ;;  %1872 = vrot.lane.b32.xlu2 %v1131_v63, %s2101_s16  ;;  %vm1900_vm13 = vcmask 89088  }
 0x4af   :  { %v1133_v43 = vadd.f32 %v3115_v30, %v1124_v27  ;;  %v1096_v31 = vmul.f32 %v2073_v36, %v1095_v57  ;;  %v1090_v62 = vsel %vm1089_vm2, %v3120_v32, %v1086_v9 }
 0x4b0   :  { %v1106_v19 = vmul.f32 %v2075_v26, %v1105_v40  ;;  %1874 = vrot.lane.b32.xlu0 %v1132_v35, %s2101_s16  ;;  %v1116_v24 = vmul.f32 %v1090_v62, %v1020_v50 }
 0x4b1   :  { %v1100_v17 = vsel %vm1099_vm5, %v2073_v36, %v1096_v31 }
 0x4b2   :  { %1876 = vrot.lane.b32.xlu1 %v1133_v43, %s2101_s16  ;;  %v1110_v13 = vsel %vm1109_vm9, %v2075_v26, %v1106_v19  ;;  %v1117_v37 = vmul.f32 %v1100_v17, %v1021_v42  ;;  %v1125_v46 = vmul.f32 %v3074_v22, %v1116_v24 }
 0x4b3   :  { %v1118_v28 = vmul.f32 %v1110_v13, %v1022_v4 }
 0x4b4   :  { %v1126_v48 = vmul.f32 %v3074_v22, %v1117_v37  ;;  %v3192_v51 = vadd.f32 %v3115_v30, %v1125_v46 }
 0x4b5   :  { %v1127_v34 = vmul.f32 %v3074_v22, %v1118_v28  ;;  %v1547_v22 = vpop.f32.mrf.mxu1 }
 0x4b6   :  { %v3195_v14 = vadd.f32 %v3115_v30, %v1126_v48 }
 0x4b7   :  { %v3198_v60 = vadd.f32 %v3115_v30, %v1127_v34 }
 0x4bd   :  { %v1550_v52 = vpop.f32.mrf.mxu1 }
 0x4c5   :  { %v1553_v5 = vpop.f32.mrf.mxu1 }
 0x4cd   :  { %v1556_v2 = vpop.f32.mrf.mxu1 }
 0x4d5   :  { %v1609_v47 = vpop.f32.mrf.mxu0  ;;  %v1559_v15 = vpop.f32.mrf.mxu1 }
 0x4d6   :  { %v1610_v61 = vadd.f32 %v1609_v47, %v1544_v41 }
 0x4d8   :  { %v3209_v1 = vadd.f32 %v3206_v11, %v1610_v61 }
 0x4da   :  { %v1642_v0 = vsel %vm217_vm11, %v3209_v1, 0.0  ;;  %v1674_v30 = vmul.f32 %v3209_v1, %v3209_v1 }
 0x4db   :  { %1643 = vadd.xlane.f32.xlu2 %v1642_v0 }
 0x4dc   :  { %v1682_v32 = vsel %vm217_vm11, %v1674_v30, 0.0 }
 0x4dd   :  { %1683 = vadd.xlane.f32.xlu1 %v1682_v32  ;;  %v1612_v23 = vpop.f32.mrf.mxu0  ;;  %v1562_v57 = vpop.f32.mrf.mxu1 }
 0x4de   :  { %v1613_v10 = vadd.f32 %v1612_v23, %v1547_v22 }
 0x4e0   :  { %v3217_v58 = vadd.f32 %v3206_v11, %v1613_v10 }
 0x4e2   :  { %v1645_v36 = vsel %vm217_vm11, %v3217_v58, 0.0  ;;  %v1675_v18 = vmul.f32 %v3217_v58, %v3217_v58 }
 0x4e3   :  { %1646 = vadd.xlane.f32.xlu0 %v1645_v36 }
 0x4e4   :  { %v1685_v7 = vsel %vm217_vm11, %v1675_v18, 0.0 }
 0x4e5   :  { %1686 = vadd.xlane.f32.xlu2 %v1685_v7  ;;  %v1565_v19 = vpop.f32.mrf.mxu1 }
 0x4e7   :  { %v1615_v26 = vpop.f32.mrf.mxu0 }
 0x4e8   :  { %v1616_v25 = vadd.f32 %v1615_v26, %v1550_v52 }
 0x4ea   :  { %v3225_v45 = vadd.f32 %v3206_v11, %v1616_v25 }
 0x4ec   :  { %v1648_v3 = vsel %vm217_vm11, %v3225_v45, 0.0  ;;  %v1676_v54 = vmul.f32 %v3225_v45, %v3225_v45 }
 0x4ed   :  { %1649 = vadd.xlane.f32.xlu1 %v1648_v3 }
 0x4ee   :  { %v1688_v44 = vsel %vm217_vm11, %v1676_v54, 0.0 }
 0x4ef   :  { %v1618_v53 = vpop.f32.mrf.mxu0  ;;  %1689 = vadd.xlane.f32.xlu0 %v1688_v44 }
 0x4f0   :  { %v1619_v16 = vadd.f32 %v1618_v53, %v1553_v5 }
 0x4f2   :  { %v3233_v56 = vadd.f32 %v3206_v11, %v1619_v16 }
 0x4f4   :  { %v1651_v59 = vsel %vm217_vm11, %v3233_v56, 0.0  ;;  %v1677_v8 = vmul.f32 %v3233_v56, %v3233_v56 }
 0x4f5   :  { %1652 = vadd.xlane.f32.xlu2 %v1651_v59 }
 0x4f6   :  { %v1691_v20 = vsel %vm217_vm11, %v1677_v8, 0.0 }
 0x4f7   :  { %1692 = vadd.xlane.f32.xlu1 %v1691_v20  ;;  %v1621_v55 = vpop.f32.mrf.mxu0 }
 0x4f8   :  { %v1622_v21 = vadd.f32 %v1621_v55, %v1556_v2  ;;  %v3293_v55 = vperm.slane %v3203_v6, 1 }
 0x4fa   :  { %v3241_v33 = vadd.f32 %v3206_v11, %v1622_v21 }
 0x4fc   :  { %v1654_v38 = vsel %vm217_vm11, %v3241_v33, 0.0  ;;  %v1678_v49 = vmul.f32 %v3241_v33, %v3241_v33 }
 0x4fd   :  { %1655 = vadd.xlane.f32.xlu0 %v1654_v38 }
 0x4fe   :  { %v1694_v39 = vsel %vm217_vm11, %v1678_v49, 0.0 }
 0x4ff   :  { %1695 = vadd.xlane.f32.xlu2 %v1694_v39  ;;  %v1624_v29 = vpop.f32.mrf.mxu0 }
 0x500   :  { %v1625_v12 = vadd.f32 %v1624_v29, %v1559_v15  ;;  %v3297_v29 = vperm.slane %v3203_v6, 2 }
 0x502   :  { %v3249_v27 = vadd.f32 %v3206_v11, %v1625_v12 }
 0x504   :  { %v1657_v63 = vsel %vm217_vm11, %v3249_v27, 0.0  ;;  %v1679_v9 = vmul.f32 %v3249_v27, %v3249_v27 }
 0x505   :  { %1658 = vadd.xlane.f32.xlu1 %v1657_v63 }
 0x506   :  { %v1697_v40 = vsel %vm217_vm11, %v1679_v9, 0.0 }
 0x507   :  { %v1627_v35 = vpop.f32.mrf.mxu0  ;;  %1698 = vadd.xlane.f32.xlu0 %v1697_v40 }
 0x508   :  { %v1628_v43 = vadd.f32 %v1627_v35, %v1562_v57  ;;  %v3280_v48 = vpop.permute.xlu2 %1872 }
 0x50a   :  { %v3257_v50 = vadd.f32 %v3206_v11, %v1628_v43 }
 0x50c   :  { %v1660_v31 = vsel %vm217_vm11, %v3257_v50, 0.0  ;;  %v1680_v42 = vmul.f32 %v3257_v50, %v3257_v50 }
 0x50d   :  { %1661 = vadd.xlane.f32.xlu2 %v1660_v31 }
 0x50e   :  { %v1700_v62 = vsel %vm217_vm11, %v1680_v42, 0.0 }
 0x50f   :  { %v1630_v4 = vpop.f32.mrf.mxu0  ;;  %1701 = vadd.xlane.f32.xlu1 %v1700_v62 }
 0x510   :  { %v1631_v24 = vadd.f32 %v1630_v4, %v1565_v19 }
 0x512   :  { %v3265_v17 = vadd.f32 %v3206_v11, %v1631_v24 }
 0x514   :  { %v1663_v13 = vsel %vm217_vm11, %v3265_v17, 0.0  ;;  %v1681_v37 = vmul.f32 %v3265_v17, %v3265_v17 }
 0x515   :  { %1664 = vadd.xlane.f32.xlu0 %v1663_v13 }
 0x516   :  { %v1703_v28 = vsel %vm217_vm11, %v1681_v37, 0.0 }
 0x517   :  { %1704 = vadd.xlane.f32.xlu2 %v1703_v28 }
 0x51a   :  { %v3282_v34 = vpop.permute.xlu0 %1868 }
 0x51c   :  { %v3278_v46 = vpop.permute.xlu1 %1870 }
 0x522   :  { %v3286_v22 = vpop.permute.xlu0 %1874 }
 0x524   :  { %v3284_v41 = vpop.permute.xlu1 %1876 }
 0x528   :  { %1882 = vrot.lane.b32.xlu1 %v3198_v60, %s2101_s16 }
 0x529   :  { %1878 = vrot.lane.b32.xlu0 %v3192_v51, %s2101_s16 }
 0x52f   :  { %1880 = vrot.lane.b32.xlu2 %v3195_v14, %s2101_s16 }
 0x54e   :  { %v1644_v11 = vpop.xlane.xlu2 %1643 }
 0x54f   :  { %v1666_v47 = vmul.f32 0.16666667, %v1644_v11 }
 0x550   :  { %v1684_v60 = vpop.xlane.xlu1 %1683 }
 0x551   :  { %v1714_v61 = vmul.f32 %v1666_v47, %v1666_v47  ;;  %v1706_v0 = vmul.f32 0.16666667, %v1684_v60  ;;  %v1730_v21 = vsub.f32 %v3209_v1, %v1666_v47 }
 0x553   :  { %v1722_v30 = vsub.f32 %v1706_v0, %v1714_v61 }
 0x555   :  { %v1738_v51 = vadd.f32 1e-05, %v1722_v30 }
 0x556   :  { %v1647_v32 = vpop.xlane.xlu0 %1646 }
 0x557   :  { %2076 = vrsqrt.f32 %v1738_v51  ;;  %v1667_v14 = vmul.f32 0.16666667, %v1647_v32  ;;  %vm1752_vm8 = vweird.f32 %v1738_v51 }
 0x558   :  { %v1687_v52 = vpop.xlane.xlu2 %1686 }
 0x559   :  { %v1715_v23 = vmul.f32 %v1667_v14, %v1667_v14  ;;  %v1707_v10 = vmul.f32 0.16666667, %v1687_v52  ;;  %v1731_v28 = vsub.f32 %v3217_v58, %v1667_v14 }
 0x55b   :  { %v1723_v18 = vsub.f32 %v1707_v10, %v1715_v23 }
 0x55d   :  { %v2077_v36 = vpop.eup %2076  ;;  %v1739_v5 = vadd.f32 1e-05, %v1723_v18 }
 0x55e   :  { %v1747_v7 = vmul.f32 %v2077_v36, %v1738_v51  ;;  %vm1753_vm7 = vweird.f32 %v2077_v36 }
 0x55f   :  { %2078 = vrsqrt.f32 %v1739_v5  ;;  %vm1754_vm10 = vmor %vm1752_vm8, %vm1753_vm7  ;;  %vm1762_vm14 = vweird.f32 %v1739_v5 }
 0x560   :  { %v1748_v26 = vmul.f32 %v2077_v36, %v1747_v7  ;;  %v1650_v25 = vpop.xlane.xlu1 %1649 }
 0x561   :  { %v3288_v3 = vmul.f32 0.16666667, %v1650_v25 }
 0x562   :  { %v1749_v54 = vmul.f32 0.5, %v1748_v26  ;;  %v1690_v44 = vpop.xlane.xlu0 %1689 }
 0x563   :  { %v1716_v53 = vmul.f32 %v3288_v3, %v3288_v3  ;;  %v1708_v16 = vmul.f32 0.16666667, %v1690_v44  ;;  %v1732_v25 = vsub.f32 %v3225_v45, %v3288_v3 }
 0x564   :  { %v1750_v2 = vsub.f32 1.5, %v1749_v54 }
 0x565   :  { %v1724_v59 = vsub.f32 %v1708_v16, %v1716_v53  ;;  %v2079_v20 = vpop.eup %2078 }
 0x566   :  { %v1751_v8 = vmul.f32 %v2077_v36, %v1750_v2  ;;  %v1757_v49 = vmul.f32 %v2079_v20, %v1739_v5  ;;  %vm1763_vm12 = vweird.f32 %v2079_v20 }
 0x567   :  { %v1740_v15 = vadd.f32 1e-05, %v1724_v59  ;;  %vm1764_vm3 = vmor %vm1762_vm14, %vm1763_vm12 }
 0x568   :  { %v1755_v38 = vsel %vm1754_vm10, %v2077_v36, %v1751_v8  ;;  %v1653_v39 = vpop.xlane.xlu2 %1652  ;;  %v1758_v63 = vmul.f32 %v2079_v20, %v1757_v49 }
 0x569   :  { %v1826_v12 = vmul.f32 %v1755_v38, %v1730_v21  ;;  %2080 = vrsqrt.f32 %v1740_v15  ;;  %v3299_v57 = vmul.f32 0.16666667, %v1653_v39  ;;  %vm1772_vm0 = vweird.f32 %v1740_v15 }
 0x56a   :  { %v1693_v9 = vpop.xlane.xlu1 %1692  ;;  %v1759_v43 = vmul.f32 0.5, %v1758_v63 }
 0x56b   :  { %v1835_v40 = vmul.f32 %v3293_v55, %v1826_v12  ;;  %v1717_v35 = vmul.f32 %v3299_v57, %v3299_v57  ;;  %v1709_v1 = vmul.f32 0.16666667, %v1693_v9  ;;  %v1733_v9 = vsub.f32 %v3233_v56, %v3299_v57 }
 0x56c   :  { %v1760_v19 = vsub.f32 1.5, %v1759_v43 }
 0x56d   :  { %v1844_v31 = vadd.f32 %v3297_v29, %v1835_v40  ;;  %v1725_v42 = vsub.f32 %v1709_v1, %v1717_v35 }
 0x56e   :  { %v1761_v24 = vmul.f32 %v2079_v20, %v1760_v19 }
 0x56f   :  { %v2081_v6 = vpop.eup %2080  ;;  %v1852_v62 = vmax.f32 %v1844_v31, 0.0  ;;  %v1741_v4 = vadd.f32 1e-05, %v1725_v42 }
 0x570   :  { %v1767_v13 = vmul.f32 %v2081_v6, %v1740_v15  ;;  %v1656_v11 = vpop.xlane.xlu0 %1655  ;;  %v1765_v47 = vsel %vm1764_vm3, %v2079_v20, %v1761_v24  ;;  %vm1773_vm15 = vweird.f32 %v2081_v6 }
 0x571   :  { %v1892_v37 = vsel %vm217_vm11, %v1852_v62, %v3282_v34  ;;  %2082 = vrsqrt.f32 %v1741_v4  ;;  %v3308_v60 = vmul.f32 0.16666667, %v1656_v11  ;;  %v1827_v30 = vmul.f32 %v1765_v47, %v1731_v28  ;;  %vm1774_vm1 = vmor %vm1772_vm0, %vm1773_vm15 }
 0x572   :  { %v1768_v61 = vmul.f32 %v2081_v6, %v1767_v13  ;;  %v1901_v0 = vsel %vm1900_vm13, %v1892_v37, 0.0  ;;  %v1696_v51 = vpop.xlane.xlu2 %1695  ;;  %vm1782_vm4 = vweird.f32 %v1741_v4 }
 0x573   :  { %1909 = vst [vmem:[%s3412_s19] sm:$0xff] %v1901_v0  ;;  %v1718_v34 = vmul.f32 %v3308_v60, %v3308_v60  ;;  %v1710_v58 = vmul.f32 0.16666667, %v1696_v51  ;;  %v1836_v14 = vmul.f32 %v3293_v55, %v1827_v30  ;;  %v1734_v51 = vsub.f32 %v3241_v33, %v3308_v60 }
 0x574   :  { %v1769_v32 = vmul.f32 0.5, %v1768_v61 }
 0x575   :  { %v1726_v23 = vsub.f32 %v1710_v58, %v1718_v34  ;;  %v1845_v36 = vadd.f32 %v3297_v29, %v1836_v14 }
 0x576   :  { %v1770_v52 = vsub.f32 1.5, %v1769_v32 }
 0x577   :  { %v2083_v10 = vpop.eup %2082  ;;  %v1742_v5 = vadd.f32 1e-05, %v1726_v23  ;;  %v1853_v26 = vmax.f32 %v1845_v36, 0.0 }
 0x578   :  { %v1771_v18 = vmul.f32 %v2081_v6, %v1770_v52  ;;  %v1777_v7 = vmul.f32 %v2083_v10, %v1741_v4  ;;  %v1659_v54 = vpop.xlane.xlu1 %1658  ;;  %vm1783_vm2 = vweird.f32 %v2083_v10 }
 0x579   :  { %2084 = vrsqrt.f32 %v1742_v5  ;;  %v1893_v16 = vsel %vm217_vm11, %v1853_v26, %v3278_v46  ;;  %v3322_v59 = vmul.f32 0.16666667, %v1659_v54  ;;  %vm1784_vm5 = vmor %vm1782_vm4, %vm1783_vm2  ;;  %vm1792_vm9 = vweird.f32 %v1742_v5 }
 0x57a   :  { %v1775_v44 = vsel %vm1774_vm1, %v2081_v6, %v1771_v18  ;;  %v1778_v53 = vmul.f32 %v2083_v10, %v1777_v7  ;;  %v1699_v8 = vpop.xlane.xlu0 %1698  ;;  %v1902_v15 = vsel %vm1900_vm13, %v1893_v16, 0.0 }
 0x57b   :  { %v1828_v2 = vmul.f32 %v1775_v44, %v1732_v25  ;;  %v1711_v21 = vmul.f32 0.16666667, %v1699_v8  ;;  %v1719_v45 = vmul.f32 %v3322_v59, %v3322_v59  ;;  %1910 = vst [vmem:[%s3412_s19 + $0x8] sm:$0xff] %v1902_v15 }
 0x57c   :  { %v1779_v20 = vmul.f32 0.5, %v1778_v53 }
 0x57d   :  { %v1837_v38 = vmul.f32 %v3293_v55, %v1828_v2  ;;  %v1727_v49 = vsub.f32 %v1711_v21, %v1719_v45  ;;  %v1735_v2 = vsub.f32 %v3249_v27, %v3322_v59 }
 0x57e   :  { %v1780_v3 = vsub.f32 1.5, %v1779_v20 }
 0x57f   :  { %v1846_v46 = vadd.f32 %v3297_v29, %v1837_v38  ;;  %v2085_v39 = vpop.eup %2084  ;;  %v1743_v35 = vadd.f32 1e-05, %v1727_v49 }
 0x580   :  { %v1781_v12 = vmul.f32 %v2083_v10, %v1780_v3  ;;  %v1787_v40 = vmul.f32 %v2085_v39, %v1742_v5  ;;  %v1662_v1 = vpop.xlane.xlu2 %1661  ;;  %vm1793_vm6 = vweird.f32 %v2085_v39 }
 0x581   :  { %v1854_v63 = vmax.f32 %v1846_v46, 0.0  ;;  %v3334_v31 = vmul.f32 0.16666667, %v1662_v1  ;;  %2086 = vrsqrt.f32 %v1743_v35  ;;  %vm1794_vm7 = vmor %vm1792_vm9, %vm1793_vm6  ;;  %vm1802_vm10 = vweird.f32 %v1743_v35 }
 0x582   :  { %v1785_v43 = vsel %vm1784_vm5, %v2083_v10, %v1781_v12  ;;  %v1788_v6 = vmul.f32 %v2085_v39, %v1787_v40  ;;  %v1702_v62 = vpop.xlane.xlu1 %1701 }
 0x583   :  { %v1894_v42 = vsel %vm217_vm11, %v1854_v63, %v3280_v48  ;;  %v1829_v19 = vmul.f32 %v1785_v43, %v1733_v9  ;;  %v1720_v4 = vmul.f32 %v3334_v31, %v3334_v31  ;;  %v1712_v24 = vmul.f32 0.16666667, %v1702_v62 }
 0x584   :  { %v1789_v57 = vmul.f32 0.5, %v1788_v6  ;;  %v1903_v13 = vsel %vm1900_vm13, %v1894_v42, 0.0 }
 0x585   :  { %v1838_v56 = vmul.f32 %v3293_v55, %v1829_v19  ;;  %v1728_v37 = vsub.f32 %v1712_v24, %v1720_v4  ;;  %1911 = vst [vmem:[%s3412_s19 + $0x10] sm:$0xff] %v1903_v13 }
 0x586   :  { %v1790_v28 = vsub.f32 1.5, %v1789_v57 }
 0x587   :  { %v1847_v48 = vadd.f32 %v3297_v29, %v1838_v56  ;;  %v1744_v11 = vadd.f32 1e-05, %v1728_v37  ;;  %v2087_v47 = vpop.eup %2086 }
 0x588   :  { %v1791_v0 = vmul.f32 %v2085_v39, %v1790_v28  ;;  %v1665_v30 = vpop.xlane.xlu0 %1664  ;;  %v1797_v32 = vmul.f32 %v2087_v47, %v1743_v35  ;;  %vm1803_vm8 = vweird.f32 %v2087_v47 }
 0x589   :  { %v1855_v61 = vmax.f32 %v1847_v48, 0.0  ;;  %2088 = vrsqrt.f32 %v1744_v11  ;;  %v3350_v14 = vmul.f32 0.16666667, %v1665_v30  ;;  %vm1804_vm12 = vmor %vm1802_vm10, %vm1803_vm8  ;;  %vm1812_vm3 = vweird.f32 %v1744_v11 }
 0x58a   :  { %v1795_v58 = vsel %vm1794_vm7, %v2085_v39, %v1791_v0  ;;  %v1705_v52 = vpop.xlane.xlu2 %1704  ;;  %v1798_v10 = vmul.f32 %v2087_v47, %v1797_v32 }
 0x58b   :  { %v1895_v34 = vsel %vm217_vm11, %v1855_v61, %v3286_v22  ;;  %v1830_v23 = vmul.f32 %v1795_v58, %v1734_v51  ;;  %v1713_v36 = vmul.f32 0.16666667, %v1705_v52  ;;  %v1721_v7 = vmul.f32 %v3350_v14, %v3350_v14 }
 0x58c   :  { %v1904_v18 = vsel %vm1900_vm13, %v1895_v34, 0.0  ;;  %v1799_v60 = vmul.f32 0.5, %v1798_v10  ;;  %v1737_v4 = vsub.f32 %v3265_v17, %v3350_v14 }
 0x58d   :  { %1912 = vst [vmem:[%s3412_s19 + $0x18] sm:$0xff] %v1904_v18  ;;  %v1839_v33 = vmul.f32 %v3293_v55, %v1830_v23  ;;  %v1729_v22 = vsub.f32 %v1713_v36, %v1721_v7 }
 0x58e   :  { %v1800_v25 = vsub.f32 1.5, %v1799_v60 }
 0x58f   :  { %v2089_v5 = vpop.eup %2088  ;;  %v1848_v26 = vadd.f32 %v3297_v29, %v1839_v33  ;;  %v1745_v44 = vadd.f32 1e-05, %v1729_v22 }
 0x590   :  { %v1807_v54 = vmul.f32 %v2089_v5, %v1744_v11  ;;  %v1801_v16 = vmul.f32 %v2087_v47, %v1800_v25  ;;  %vm1813_vm14 = vweird.f32 %v2089_v5 }
 0x591   :  { %v1856_v53 = vmax.f32 %v1848_v26, 0.0  ;;  %2090 = vrsqrt.f32 %v1745_v44  ;;  %vm1814_vm15 = vmor %vm1812_vm3, %vm1813_vm14  ;;  %vm1822_vm1 = vweird.f32 %v1745_v44 }
 0x592   :  { %v1808_v8 = vmul.f32 %v2089_v5, %v1807_v54  ;;  %v1805_v21 = vsel %vm1804_vm12, %v2087_v47, %v1801_v16  ;;  %v1881_v24 = vpop.permute.xlu2 %1880 }
 0x593   :  { %v1896_v20 = vsel %vm217_vm11, %v1856_v53, %v3284_v41  ;;  %v1831_v45 = vmul.f32 %v1805_v21, %v1735_v2  ;;  %v1736_v41 = vsub.f32 %v3257_v50, %v3334_v31 }
 0x594   :  { %v1809_v15 = vmul.f32 0.5, %v1808_v8  ;;  %v1905_v38 = vsel %vm1900_vm13, %v1896_v20, 0.0 }
 0x595   :  { %1913 = vst [vmem:[%s3412_s19 + $0x20] sm:$0xff] %v1905_v38  ;;  %v1840_v46 = vmul.f32 %v3293_v55, %v1831_v45 }
 0x596   :  { %v1810_v3 = vsub.f32 1.5, %v1809_v15 }
 0x597   :  { %v2091_v27 = vpop.eup %2090  ;;  %v1849_v49 = vadd.f32 %v3297_v29, %v1840_v46 }
 0x598   :  { %v1811_v59 = vmul.f32 %v2089_v5, %v1810_v3  ;;  %v1817_v39 = vmul.f32 %v2091_v27, %v1745_v44  ;;  %vm1823_vm0 = vweird.f32 %v2091_v27 }
 0x599   :  { %v1857_v63 = vmax.f32 %v1849_v49, 0.0  ;;  %vm1824_vm2 = vmor %vm1822_vm1, %vm1823_vm0 }
 0x59a   :  { %v1815_v12 = vsel %vm1814_vm15, %v2089_v5, %v1811_v59  ;;  %v1818_v9 = vmul.f32 %v2091_v27, %v1817_v39  ;;  %v1883_v47 = vpop.permute.xlu1 %1882 }
 0x59b   :  { %v1832_v40 = vmul.f32 %v1815_v12, %v1736_v41  ;;  %v1879_v35 = vpop.permute.xlu0 %1878 }
 0x59c   :  { %v1897_v1 = vsel %vm217_vm11, %v1857_v63, %v1879_v35  ;;  %v1819_v43 = vmul.f32 0.5, %v1818_v9 }
 0x59d   :  { %v1841_v42 = vmul.f32 %v3293_v55, %v1832_v40  ;;  %v1906_v19 = vsel %vm1900_vm13, %v1897_v1, 0.0 }
 0x59e   :  { %1914 = vst [vmem:[%s3412_s19 + $0x28] sm:$0xff] %v1906_v19  ;;  %v1820_v6 = vsub.f32 1.5, %v1819_v43 }
 0x59f   :  { %v1850_v50 = vadd.f32 %v3297_v29, %v1841_v42 }
 0x5a0   :  { %v1821_v31 = vmul.f32 %v2091_v27, %v1820_v6 }
 0x5a1   :  { %v1858_v62 = vmax.f32 %v1850_v50, 0.0 }
 0x5a2   :  { %v1825_v56 = vsel %vm1824_vm2, %v2091_v27, %v1821_v31 }
 0x5a3   :  { %v1898_v57 = vsel %vm217_vm11, %v1858_v62, %v1881_v24  ;;  %v1833_v37 = vmul.f32 %v1825_v56, %v1737_v4 }
 0x5a4   :  { %v1907_v13 = vsel %vm1900_vm13, %v1898_v57, 0.0 }
 0x5a5   :  { %1915 = vst [vmem:[%s3412_s19 + $0x30] sm:$0xff] %v1907_v13  ;;  %v1842_v48 = vmul.f32 %v3293_v55, %v1833_v37 }
 0x5a7   :  { %v1851_v28 = vadd.f32 %v3297_v29, %v1842_v48 }
 0x5a9   :  { %v1859_v11 = vmax.f32 %v1851_v28, 0.0 }
 0x5ab   :  { %v1899_v17 = vsel %vm217_vm11, %v1859_v11, %v1883_v47 }
 0x5ac   :  { %v1908_v61 = vsel %vm1900_vm13, %v1899_v17, 0.0 }
 0x5ad   :  { %1916 = vst [vmem:[%s3412_s19 + $0x38] sm:$0xff] %v1908_v61 }

</bundles_post_ra>
